<compile_context>
chip_gen: v6e
topology: v6e:2x2x1
jax: 0.10.0
libtpu: 0.0.40
codegen_flags: <defaults>
</compile_context>

<pallas_src>
from collections import OrderedDict
from functools import partial

import jax
import jax.numpy as jnp
from jax.experimental import pallas as pl
from jax.experimental.pallas import tpu as pltpu

_TM_MAX = 128      # row-tile cap (MXU-shaped)
_LANE = 128        # channel lane padding
_SUBL = 16         # bf16 sublane packing -> row tiles are multiples of 16


def _round_up(x, m):
    return ((x + m - 1) // m) * m


def _choose_row_tile(m):
    """Adaptive row tile: multiple of 16 (bf16 packing), capped at 128, and
    halved when possible so the grid has >=2 steps (v7x megacore sharding)."""
    tm = min(_TM_MAX, _round_up(m, _SUBL))
    if _round_up(m, tm) // tm < 2 and tm > _SUBL:
        half = _round_up(tm // 2, _SUBL)
        if _round_up(m, half) // half >= 2:
            tm = half
    return tm


# ----------------------------------------------------------------------------
# Fused per-stage Pallas kernel:
#   y0 = x @ Wc + bc                    (patchify conv as matmul, f32 acc)
#   ln = LayerNorm(y0) (real channels)  (stats in f32, no lane mask needed)
#   y  = GELU(ln @ W1 + b1) @ W2 + b2
#   out = y0 + y                        (residual; padded lanes stay zero)
# ----------------------------------------------------------------------------
def _stage_kernel(x_ref, wc_ref, bc_ref, g_ref, be_ref,
                  w1_ref, b1_ref, w2_ref, b2_ref, o_ref, *, cout, eps):
    # "conv": (TM, K) bf16 @ (K, Cpad) bf16 -> f32 accumulation on the MXU
    y0 = jnp.dot(x_ref[...], wc_ref[...],
                 preferred_element_type=jnp.float32) + bc_ref[...]

    # LayerNorm over the real `cout` channels.  Padded lanes of y0 are exactly
    # zero (zero-padded wc/bc), so plain sums over all lanes equal sums over
    # the real channels; no iota/compare/select lane mask is needed.
    # var = E[x^2] - mu^2 is slightly less numerically robust than the masked
    # deviation form but is well within tolerance at these magnitudes.
    # Padded *rows* (M padded to the tile) see var ~ 0 and produce finite
    # garbage that the wrapper slices off; keep masking them if they are ever
    # reused in-kernel (e.g. in-kernel patchify of the next stage).
    inv_c = 1.0 / cout
    mu = jnp.sum(y0, axis=-1, keepdims=True) * inv_c
    var = jnp.sum(y0 * y0, axis=-1, keepdims=True) * inv_c - mu * mu
    ln = (y0 - mu) * jax.lax.rsqrt(var + eps) * g_ref[...] + be_ref[...]
    # (padded lanes of ln are re-zeroed by the zero-padded gamma/beta)

    # MLP (padded lanes remain zero because padded weight rows/cols are zero)
    h = jnp.dot(ln.astype(jnp.bfloat16), w1_ref[...],
                preferred_element_type=jnp.float32) + b1_ref[...]
    # TODO(synk): PyTorch nn.GELU default is the exact erf form; tanh approx
    # is used here (EUP-friendly).  Kept in f32 for v5e (no bf16 VPU/EUP).
    h = jax.nn.gelu(h, approximate=True)
    y = jnp.dot(h.astype(jnp.bfloat16), w2_ref[...],
                preferred_element_type=jnp.float32) + b2_ref[...]

    o_ref[...] = (y0 + y).astype(o_ref.dtype)


_WEIGHTS_SINGLE_BUFFERED = None   # lazily probed pl.Buffered(1) support


def _build_stage_call(tm, mp, k, cpad, hpad, cout, single_buffer_weights):
    def const_spec(shape):
        idx = lambda i: (0,) * len(shape)
        if single_buffer_weights:
            # constant index_map -> block never changes; no double-buffering
            return pl.BlockSpec(shape, idx, pipeline_mode=pl.Buffered(1))
        return pl.BlockSpec(shape, idx)

    wbuf = 1 if single_buffer_weights else 2
    vmem_est = (wbuf * ((k * cpad + cpad * hpad + hpad * cpad) * 2   # bf16 weights
                        + (4 * cpad + hpad) * 4)                     # f32 biases/LN
                + 2 * (tm * k + tm * cpad) * 2)                      # 2x act tiles
    vmem_limit = int(min(64 << 20, max(32 << 20, 2 * vmem_est)))

    kernel = partial(_stage_kernel, cout=cout, eps=1e-6)
    return pl.pallas_call(
        kernel,
        out_shape=jax.ShapeDtypeStruct((mp, cpad), jnp.bfloat16),
        grid=(mp // tm,),
        in_specs=[
            pl.BlockSpec((tm, k), lambda i: (i, 0)),   # activations (pipelined)
            const_spec((k, cpad)),                     # conv weight (resident)
            const_spec((1, cpad)),                     # conv bias
            const_spec((1, cpad)),                     # LN gamma
            const_spec((1, cpad)),                     # LN beta
            const_spec((cpad, hpad)),                  # W1 (resident)
            const_spec((1, hpad)),                     # b1
            const_spec((hpad, cpad)),                  # W2 (resident)
            const_spec((1, cpad)),                     # b2
        ],
        out_specs=pl.BlockSpec((tm, cpad), lambda i: (i, 0)),
        compiler_params=pltpu.CompilerParams(
            dimension_semantics=("parallel",),
            vmem_limit_bytes=vmem_limit),
    )


def fused_stage(x_tok, sp):
    """x_tok: (M, K) bf16 tokens -> (M, Cpad) bf16 tokens, lane-padded."""
    global _WEIGHTS_SINGLE_BUFFERED
    m, k = x_tok.shape
    tm = _choose_row_tile(m)
    mp = _round_up(m, tm)
    if mp != m:
        x_tok = jnp.pad(x_tok, ((0, mp - m), (0, 0)))
    cpad = sp["wc"].shape[1]
    hpad = sp["w1"].shape[1]
    args = (x_tok, sp["wc"], sp["bc"], sp["g"], sp["be"],
            sp["w1"], sp["b1"], sp["w2"], sp["b2"])

    modes = ((True, False) if _WEIGHTS_SINGLE_BUFFERED is None
             else (_WEIGHTS_SINGLE_BUFFERED,))
    out = None
    for single in modes:
        try:
            call = _build_stage_call(tm, mp, k, cpad, hpad, sp["cout"], single)
            out = jax.block_until_ready(call(*args))
            _WEIGHTS_SINGLE_BUFFERED = single
            break
        except Exception:
            if not single:
                raise
    return out[:m]


# ----------------------------------------------------------------------------
# Patchify on channels-last tokens (kernel==stride => plain reshape+transpose)
# ----------------------------------------------------------------------------
def _patchify_nhwc(x_nhwc, p):
    n, h, w, c = x_nhwc.shape
    ho, wo = h // p, w // p
    t = x_nhwc.reshape(n, ho, p, wo, p, c).transpose(0, 1, 3, 2, 4, 5)
    return t.reshape(n * ho * wo, p * p * c), (n, ho, wo)


# ----------------------------------------------------------------------------
# Deterministic parameters, pre-laid-out in kernel layout (bf16, lane-padded)
# ----------------------------------------------------------------------------
def make_params(key, in_chans=3, dims=(8, 16, 32, 64)):
    keys = jax.random.split(key, 3 * len(dims))
    ki = iter(range(len(keys)))

    def nrm(shape, scale):
        return scale * jax.random.normal(keys[next(ki)], shape, dtype=jnp.float32)

    def pad_vec(v, n):
        return jnp.zeros((1, n), jnp.float32).at[0, : v.shape[0]].set(v)

    def pad_mat(w, r, c):
        return jnp.zeros((r, c), jnp.float32).at[: w.shape[0], : w.shape[1]].set(w)

    params = []
    # stage-0 input channels padded 3 -> 8 so K = 4*4*8 = 128 (lane-dense LHS,
    # aligned MXU contraction depth); later stages inherit the lane-padded cpad.
    cin, cin_pad = in_chans, _round_up(in_chans, 8)
    for s, cout in enumerate(dims):
        p = 4 if s == 0 else 2
        cpad = _round_up(cout, _LANE)
        hid = 4 * cout
        hpad = _round_up(hid, _LANE)

        fan_in = cin * p * p
        conv_w = nrm((cout, cin, p, p), (2.0 / fan_in) ** 0.5)   # PyTorch layout
        conv_b = jnp.zeros((cout,), jnp.float32)
        gamma = jnp.ones((cout,), jnp.float32)
        beta = jnp.zeros((cout,), jnp.float32)
        w1 = nrm((cout, hid), (2.0 / cout) ** 0.5)
        b1 = jnp.zeros((hid,), jnp.float32)
        w2 = nrm((hid, cout), (2.0 / hid) ** 0.5)
        b2 = jnp.zeros((cout,), jnp.float32)

        # Kernel layout: conv weight flattened in (ph, pw, cin_pad) K-order,
        # Cout on the lane axis, zero-padded so padded lanes contribute nothing.
        wc = (jnp.zeros((p, p, cin_pad, cpad), jnp.float32)
              .at[:, :, :cin, :cout].set(jnp.transpose(conv_w, (2, 3, 1, 0)))
              .reshape(p * p * cin_pad, cpad))

        params.append({
            "p": p, "cout": cout,
            "wc": wc.astype(jnp.bfloat16),
            "bc": pad_vec(conv_b, cpad),
            "g": pad_vec(gamma, cpad),
            "be": pad_vec(beta, cpad),
            "w1": pad_mat(w1, cpad, hpad).astype(jnp.bfloat16),
            "b1": pad_vec(b1, hpad),
            "w2": pad_mat(w2, hpad, cpad).astype(jnp.bfloat16),
            "b2": pad_vec(b2, cpad),
            # unpadded f32 copies for the pure-JAX reference
            "ref": dict(conv_w=conv_w, conv_b=conv_b, gamma=gamma, beta=beta,
                        w1=w1, b1=b1, w2=w2, b2=b2),
        })
        cin, cin_pad = cout, cpad
    return params


# ----------------------------------------------------------------------------
# Backbone forward: returns OrderedDict {"P0": ..., "P3": ...} of NCHW features
# ----------------------------------------------------------------------------
def backbone_forward(x_nchw, params, out_indices=(0, 1, 2, 3)):
    # NCHW -> NHWC once; tokens are then carried channels-last and lane-padded.
    cur = jnp.transpose(x_nchw, (0, 2, 3, 1)).astype(jnp.bfloat16)
    cin = cur.shape[-1]
    cin_pad = _round_up(cin, 8)
    if cin_pad != cin:
        cur = jnp.pad(cur, ((0, 0), (0, 0), (0, 0), (0, cin_pad - cin)))
    feats = []
    for sp in params:
        tok, (n, ho, wo) = _patchify_nhwc(cur, sp["p"])
        out = fused_stage(tok, sp)                  # (M, Cpad) bf16, pad lanes = 0
        cur = out.reshape(n, ho, wo, out.shape[1])
        feats.append((cur, sp["cout"]))
    result = OrderedDict()
    for i, (f, cout) in enumerate(feats[j] for j in out_indices):
        # strip lane padding once, return NCHW f32 like the PyTorch backbone
        result[f"P{i}"] = jnp.transpose(f[..., :cout].astype(jnp.float32),
                                        (0, 3, 1, 2))
    return result


# ----------------------------------------------------------------------------
# Pure-JAX f32 reference (same math, unpadded) for a correctness check
# ----------------------------------------------------------------------------
def reference_forward(x_nchw, params, out_indices=(0, 1, 2, 3)):
    cur = jnp.transpose(x_nchw, (0, 2, 3, 1)).astype(jnp.float32)
    feats = []
    for sp in params:
        r, p, cout = sp["ref"], sp["p"], sp["cout"]
        tok, (n, ho, wo) = _patchify_nhwc(cur, p)
        wflat = jnp.transpose(r["conv_w"], (2, 3, 1, 0)).reshape(-1, cout)
        y0 = tok @ wflat + r["conv_b"]
        mu = jnp.mean(y0, axis=-1, keepdims=True)
        var = jnp.mean((y0 - mu) ** 2, axis=-1, keepdims=True)
        ln = (y0 - mu) * jax.lax.rsqrt(var + 1e-6) * r["gamma"] + r["beta"]
        h = jax.nn.gelu(ln @ r["w1"] + r["b1"], approximate=True)
        y = h @ r["w2"] + r["b2"]
        cur = (y0 + y).reshape(n, ho, wo, cout)
        feats.append(cur)
    return OrderedDict(
        (f"P{i}", jnp.transpose(feats[j], (0, 3, 1, 2)))
        for i, j in enumerate(out_indices))


if __name__ == "__main__":
    key = jax.random.PRNGKey(0)
    kx, kp = jax.random.split(key)
    x = jax.random.normal(kx, (2, 3, 32, 32), dtype=jnp.float32)  # NCHW
    params = make_params(kp)

    out = backbone_forward(x, params)
    for v in out.values():
        jax.block_until_ready(v)

    expected = {"P0": (2, 8, 8, 8), "P1": (2, 16, 4, 4),
                "P2": (2, 32, 2, 2), "P3": (2, 64, 1, 1)}
    assert list(out.keys()) == ["P0", "P1", "P2", "P3"]
    for k, shp in expected.items():
        assert out[k].shape == shp, (k, out[k].shape)
        assert bool(jnp.all(jnp.isfinite(out[k])))

    # loose tolerance: bf16 MXU inputs vs. f32 reference
    ref = reference_forward(x, params)
    for k in out:
        a, b = out[k], ref[k]
        rel = jnp.linalg.norm(a - b) / (jnp.linalg.norm(b) + 1e-6)
        assert float(rel) < 5e-2, (k, float(rel))

    print("KERNEL_OK")
</pallas_src>

<mosaic_0001>
module attributes {stable_mosaic.version = 11 : i64} {
  func.func @_stage_kernel(%arg0: i32, %arg1: memref<64x128xbf16, #tpu.memory_space<vmem>>, %arg2: memref<128x128xbf16, #tpu.memory_space<vmem>>, %arg3: memref<1x128xf32, #tpu.memory_space<vmem>>, %arg4: memref<1x128xf32, #tpu.memory_space<vmem>>, %arg5: memref<1x128xf32, #tpu.memory_space<vmem>>, %arg6: memref<128x128xbf16, #tpu.memory_space<vmem>>, %arg7: memref<1x128xf32, #tpu.memory_space<vmem>>, %arg8: memref<128x128xbf16, #tpu.memory_space<vmem>>, %arg9: memref<1x128xf32, #tpu.memory_space<vmem>>, %arg10: memref<64x128xbf16, #tpu.memory_space<vmem>>) attributes {dimension_semantics = [#tpu.dimension_semantics<parallel>], iteration_bounds = array<i64: 2>, scalar_prefetch = 0 : i64, scratch_operands = 0 : i64, tpu.core_type = #tpu.core_type<tc>, window_params = [{transform_indices = @transform_0, window_bounds = array<i64: 64, 128>}, {pipeline_mode = #tpu.pipeline_mode<synchronous>, transform_indices = @transform_1, window_bounds = array<i64: 128, 128>}, {pipeline_mode = #tpu.pipeline_mode<synchronous>, transform_indices = @transform_2, window_bounds = array<i64: 1, 128>}, {pipeline_mode = #tpu.pipeline_mode<synchronous>, transform_indices = @transform_3, window_bounds = array<i64: 1, 128>}, {pipeline_mode = #tpu.pipeline_mode<synchronous>, transform_indices = @transform_4, window_bounds = array<i64: 1, 128>}, {pipeline_mode = #tpu.pipeline_mode<synchronous>, transform_indices = @transform_5, window_bounds = array<i64: 128, 128>}, {pipeline_mode = #tpu.pipeline_mode<synchronous>, transform_indices = @transform_6, window_bounds = array<i64: 1, 128>}, {pipeline_mode = #tpu.pipeline_mode<synchronous>, transform_indices = @transform_7, window_bounds = array<i64: 128, 128>}, {pipeline_mode = #tpu.pipeline_mode<synchronous>, transform_indices = @transform_8, window_bounds = array<i64: 1, 128>}, {transform_indices = @transform_9, window_bounds = array<i64: 64, 128>}]} {
    %c0 = arith.constant 0 : index
    %c0_0 = arith.constant 0 : index
    %0 = vector.load %arg1[%c0, %c0_0] : memref<64x128xbf16, #tpu.memory_space<vmem>>, vector<64x128xbf16>
    %c0_1 = arith.constant 0 : index
    %c0_2 = arith.constant 0 : index
    %1 = vector.load %arg2[%c0_1, %c0_2] : memref<128x128xbf16, #tpu.memory_space<vmem>>, vector<128x128xbf16>
    %cst = arith.constant dense<0.000000e+00> : vector<64x128xf32>
    %2 = tpu.matmul %0, %1, %cst {dimension_numbers = #tpu.dot_dimension_numbers<[1], [0], [0], [1], [0, 0, 1, 1], [], []>} : vector<64x128xbf16>, vector<128x128xbf16>, vector<64x128xf32> -> vector<64x128xf32>
    %c0_3 = arith.constant 0 : index
    %c0_4 = arith.constant 0 : index
    %3 = vector.load %arg3[%c0_3, %c0_4] : memref<1x128xf32, #tpu.memory_space<vmem>>, vector<1x128xf32>
    %4 = vector.broadcast %3 : vector<1x128xf32> to vector<64x128xf32>
    %5 = arith.addf %2, %4 : vector<64x128xf32>
    %cst_5 = arith.constant dense<0.000000e+00> : vector<64xf32>
    %6 = vector.multi_reduction <add>, %5, %cst_5 [1] : vector<64x128xf32> to vector<64xf32>
    %7 = vector.shape_cast %6 : vector<64xf32> to vector<64x1xf32>
    %cst_6 = arith.constant 1.250000e-01 : f32
    %8 = vector.broadcast %cst_6 : f32 to vector<64x1xf32>
    %9 = arith.mulf %7, %8 : vector<64x1xf32>
    %10 = arith.mulf %5, %5 : vector<64x128xf32>
    %cst_7 = arith.constant dense<0.000000e+00> : vector<64xf32>
    %11 = vector.multi_reduction <add>, %10, %cst_7 [1] : vector<64x128xf32> to vector<64xf32>
    %12 = vector.shape_cast %11 : vector<64xf32> to vector<64x1xf32>
    %cst_8 = arith.constant 1.250000e-01 : f32
    %13 = vector.broadcast %cst_8 : f32 to vector<64x1xf32>
    %14 = arith.mulf %12, %13 : vector<64x1xf32>
    %15 = arith.mulf %9, %9 : vector<64x1xf32>
    %16 = arith.subf %14, %15 : vector<64x1xf32>
    %17 = vector.broadcast %9 : vector<64x1xf32> to vector<64x128xf32>
    %18 = arith.subf %5, %17 : vector<64x128xf32>
    %cst_9 = arith.constant 9.99999997E-7 : f32
    %19 = vector.broadcast %cst_9 : f32 to vector<64x1xf32>
    %20 = arith.addf %16, %19 : vector<64x1xf32>
    %21 = math.rsqrt %20 : vector<64x1xf32>
    %22 = vector.broadcast %21 : vector<64x1xf32> to vector<64x128xf32>
    %23 = arith.mulf %18, %22 : vector<64x128xf32>
    %c0_10 = arith.constant 0 : index
    %c0_11 = arith.constant 0 : index
    %24 = vector.load %arg4[%c0_10, %c0_11] : memref<1x128xf32, #tpu.memory_space<vmem>>, vector<1x128xf32>
    %25 = vector.broadcast %24 : vector<1x128xf32> to vector<64x128xf32>
    %26 = arith.mulf %23, %25 : vector<64x128xf32>
    %c0_12 = arith.constant 0 : index
    %c0_13 = arith.constant 0 : index
    %27 = vector.load %arg5[%c0_12, %c0_13] : memref<1x128xf32, #tpu.memory_space<vmem>>, vector<1x128xf32>
    %28 = vector.broadcast %27 : vector<1x128xf32> to vector<64x128xf32>
    %29 = arith.addf %26, %28 : vector<64x128xf32>
    %30 = arith.truncf %29 : vector<64x128xf32> to vector<64x128xbf16>
    %c0_14 = arith.constant 0 : index
    %c0_15 = arith.constant 0 : index
    %31 = vector.load %arg6[%c0_14, %c0_15] : memref<128x128xbf16, #tpu.memory_space<vmem>>, vector<128x128xbf16>
    %cst_16 = arith.constant dense<0.000000e+00> : vector<64x128xf32>
    %32 = tpu.matmul %30, %31, %cst_16 {dimension_numbers = #tpu.dot_dimension_numbers<[1], [0], [0], [1], [0, 0, 1, 1], [], []>} : vector<64x128xbf16>, vector<128x128xbf16>, vector<64x128xf32> -> vector<64x128xf32>
    %c0_17 = arith.constant 0 : index
    %c0_18 = arith.constant 0 : index
    %33 = vector.load %arg7[%c0_17, %c0_18] : memref<1x128xf32, #tpu.memory_space<vmem>>, vector<1x128xf32>
    %34 = vector.broadcast %33 : vector<1x128xf32> to vector<64x128xf32>
    %35 = arith.addf %32, %34 : vector<64x128xf32>
    %36 = arith.mulf %35, %35 : vector<64x128xf32>
    %37 = arith.mulf %35, %36 : vector<64x128xf32>
    %cst_19 = arith.constant 4.471500e-02 : f32
    %38 = vector.broadcast %cst_19 : f32 to vector<64x128xf32>
    %39 = arith.mulf %38, %37 : vector<64x128xf32>
    %40 = arith.addf %35, %39 : vector<64x128xf32>
    %cst_20 = arith.constant 0.797884583 : f32
    %41 = vector.broadcast %cst_20 : f32 to vector<64x128xf32>
    %42 = arith.mulf %41, %40 : vector<64x128xf32>
    %43 = math.tanh %42 : vector<64x128xf32>
    %cst_21 = arith.constant 1.000000e+00 : f32
    %44 = vector.broadcast %cst_21 : f32 to vector<64x128xf32>
    %45 = arith.addf %44, %43 : vector<64x128xf32>
    %cst_22 = arith.constant 5.000000e-01 : f32
    %46 = vector.broadcast %cst_22 : f32 to vector<64x128xf32>
    %47 = arith.mulf %46, %45 : vector<64x128xf32>
    %48 = arith.mulf %35, %47 : vector<64x128xf32>
    %49 = arith.truncf %48 : vector<64x128xf32> to vector<64x128xbf16>
    %c0_23 = arith.constant 0 : index
    %c0_24 = arith.constant 0 : index
    %50 = vector.load %arg8[%c0_23, %c0_24] : memref<128x128xbf16, #tpu.memory_space<vmem>>, vector<128x128xbf16>
    %cst_25 = arith.constant dense<0.000000e+00> : vector<64x128xf32>
    %51 = tpu.matmul %49, %50, %cst_25 {dimension_numbers = #tpu.dot_dimension_numbers<[1], [0], [0], [1], [0, 0, 1, 1], [], []>} : vector<64x128xbf16>, vector<128x128xbf16>, vector<64x128xf32> -> vector<64x128xf32>
    %c0_26 = arith.constant 0 : index
    %c0_27 = arith.constant 0 : index
    %52 = vector.load %arg9[%c0_26, %c0_27] : memref<1x128xf32, #tpu.memory_space<vmem>>, vector<1x128xf32>
    %53 = vector.broadcast %52 : vector<1x128xf32> to vector<64x128xf32>
    %54 = arith.addf %51, %53 : vector<64x128xf32>
    %55 = arith.addf %5, %54 : vector<64x128xf32>
    %56 = arith.truncf %55 : vector<64x128xf32> to vector<64x128xbf16>
    %c0_28 = arith.constant 0 : index
    %c0_29 = arith.constant 0 : index
    %57 = vector.load %arg10[%c0_28, %c0_29] : memref<64x128xbf16, #tpu.memory_space<vmem>>, vector<64x128xbf16>
    tpu.vector_store %arg10[%c0_28, %c0_29], %56 {strides = array<i32>} : memref<64x128xbf16, #tpu.memory_space<vmem>>, vector<64x128xbf16>,
    return
  }
  func.func @transform_0(%arg0: i32) -> (i32, i32) {
    %c0_i32 = arith.constant 0 : i32
    %c0_i32_0 = arith.constant 0 : i32
    return %arg0, %c0_i32 : i32, i32
  }
  func.func @transform_1(%arg0: i32) -> (i32, i32) {
    %c0_i32 = arith.constant 0 : i32
    %c0_i32_0 = arith.constant 0 : i32
    %c0_i32_1 = arith.constant 0 : i32
    return %c0_i32, %c0_i32_0 : i32, i32
  }
  func.func @transform_2(%arg0: i32) -> (i32, i32) {
    %c0_i32 = arith.constant 0 : i32
    %c0_i32_0 = arith.constant 0 : i32
    %c0_i32_1 = arith.constant 0 : i32
    return %c0_i32, %c0_i32_0 : i32, i32
  }
  func.func @transform_3(%arg0: i32) -> (i32, i32) {
    %c0_i32 = arith.constant 0 : i32
    %c0_i32_0 = arith.constant 0 : i32
    %c0_i32_1 = arith.constant 0 : i32
    return %c0_i32, %c0_i32_0 : i32, i32
  }
  func.func @transform_4(%arg0: i32) -> (i32, i32) {
    %c0_i32 = arith.constant 0 : i32
    %c0_i32_0 = arith.constant 0 : i32
    %c0_i32_1 = arith.constant 0 : i32
    return %c0_i32, %c0_i32_0 : i32, i32
  }
  func.func @transform_5(%arg0: i32) -> (i32, i32) {
    %c0_i32 = arith.constant 0 : i32
    %c0_i32_0 = arith.constant 0 : i32
    %c0_i32_1 = arith.constant 0 : i32
    return %c0_i32, %c0_i32_0 : i32, i32
  }
  func.func @transform_6(%arg0: i32) -> (i32, i32) {
    %c0_i32 = arith.constant 0 : i32
    %c0_i32_0 = arith.constant 0 : i32
    %c0_i32_1 = arith.constant 0 : i32
    return %c0_i32, %c0_i32_0 : i32, i32
  }
  func.func @transform_7(%arg0: i32) -> (i32, i32) {
    %c0_i32 = arith.constant 0 : i32
    %c0_i32_0 = arith.constant 0 : i32
    %c0_i32_1 = arith.constant 0 : i32
    return %c0_i32, %c0_i32_0 : i32, i32
  }
  func.func @transform_8(%arg0: i32) -> (i32, i32) {
    %c0_i32 = arith.constant 0 : i32
    %c0_i32_0 = arith.constant 0 : i32
    %c0_i32_1 = arith.constant 0 : i32
    return %c0_i32, %c0_i32_0 : i32, i32
  }
  func.func @transform_9(%arg0: i32) -> (i32, i32) {
    %c0_i32 = arith.constant 0 : i32
    %c0_i32_0 = arith.constant 0 : i32
    return %arg0, %c0_i32 : i32, i32
  }
}

module attributes {stable_mosaic.version = 11 : i64} {
  func.func @_stage_kernel(%arg0: i32, %arg1: memref<64x128xbf16, #tpu.memory_space<vmem>>, %arg2: memref<128x128xbf16, #tpu.memory_space<vmem>>, %arg3: memref<1x128xf32, #tpu.memory_space<vmem>>, %arg4: memref<1x128xf32, #tpu.memory_space<vmem>>, %arg5: memref<1x128xf32, #tpu.memory_space<vmem>>, %arg6: memref<128x128xbf16, #tpu.memory_space<vmem>>, %arg7: memref<1x128xf32, #tpu.memory_space<vmem>>, %arg8: memref<128x128xbf16, #tpu.memory_space<vmem>>, %arg9: memref<1x128xf32, #tpu.memory_space<vmem>>, %arg10: memref<64x128xbf16, #tpu.memory_space<vmem>>) attributes {dimension_semantics = [#tpu.dimension_semantics<parallel>], iteration_bounds = array<i64: 2>, scalar_prefetch = 0 : i64, scratch_operands = 0 : i64, tpu.core_type = #tpu.core_type<tc>, window_params = [{transform_indices = @transform_0, window_bounds = array<i64: 64, 128>}, {pipeline_mode = #tpu.pipeline_mode<synchronous>, transform_indices = @transform_1, window_bounds = array<i64: 128, 128>}, {pipeline_mode = #tpu.pipeline_mode<synchronous>, transform_indices = @transform_2, window_bounds = array<i64: 1, 128>}, {pipeline_mode = #tpu.pipeline_mode<synchronous>, transform_indices = @transform_3, window_bounds = array<i64: 1, 128>}, {pipeline_mode = #tpu.pipeline_mode<synchronous>, transform_indices = @transform_4, window_bounds = array<i64: 1, 128>}, {pipeline_mode = #tpu.pipeline_mode<synchronous>, transform_indices = @transform_5, window_bounds = array<i64: 128, 128>}, {pipeline_mode = #tpu.pipeline_mode<synchronous>, transform_indices = @transform_6, window_bounds = array<i64: 1, 128>}, {pipeline_mode = #tpu.pipeline_mode<synchronous>, transform_indices = @transform_7, window_bounds = array<i64: 128, 128>}, {pipeline_mode = #tpu.pipeline_mode<synchronous>, transform_indices = @transform_8, window_bounds = array<i64: 1, 128>}, {transform_indices = @transform_9, window_bounds = array<i64: 64, 128>}]} {
    %c0 = arith.constant 0 : index
    %c0_0 = arith.constant 0 : index
    %0 = vector.load %arg1[%c0, %c0_0] : memref<64x128xbf16, #tpu.memory_space<vmem>>, vector<64x128xbf16>
    %c0_1 = arith.constant 0 : index
    %c0_2 = arith.constant 0 : index
    %1 = vector.load %arg2[%c0_1, %c0_2] : memref<128x128xbf16, #tpu.memory_space<vmem>>, vector<128x128xbf16>
    %cst = arith.constant dense<0.000000e+00> : vector<64x128xf32>
    %2 = tpu.matmul %0, %1, %cst {dimension_numbers = #tpu.dot_dimension_numbers<[1], [0], [0], [1], [0, 0, 1, 1], [], []>} : vector<64x128xbf16>, vector<128x128xbf16>, vector<64x128xf32> -> vector<64x128xf32>
    %c0_3 = arith.constant 0 : index
    %c0_4 = arith.constant 0 : index
    %3 = vector.load %arg3[%c0_3, %c0_4] : memref<1x128xf32, #tpu.memory_space<vmem>>, vector<1x128xf32>
    %4 = vector.broadcast %3 : vector<1x128xf32> to vector<64x128xf32>
    %5 = arith.addf %2, %4 : vector<64x128xf32>
    %cst_5 = arith.constant dense<0.000000e+00> : vector<64xf32>
    %6 = vector.multi_reduction <add>, %5, %cst_5 [1] : vector<64x128xf32> to vector<64xf32>
    %7 = vector.shape_cast %6 : vector<64xf32> to vector<64x1xf32>
    %cst_6 = arith.constant 1.250000e-01 : f32
    %8 = vector.broadcast %cst_6 : f32 to vector<64x1xf32>
    %9 = arith.mulf %7, %8 : vector<64x1xf32>
    %10 = arith.mulf %5, %5 : vector<64x128xf32>
    %cst_7 = arith.constant dense<0.000000e+00> : vector<64xf32>
    %11 = vector.multi_reduction <add>, %10, %cst_7 [1] : vector<64x128xf32> to vector<64xf32>
    %12 = vector.shape_cast %11 : vector<64xf32> to vector<64x1xf32>
    %cst_8 = arith.constant 1.250000e-01 : f32
    %13 = vector.broadcast %cst_8 : f32 to vector<64x1xf32>
    %14 = arith.mulf %12, %13 : vector<64x1xf32>
    %15 = arith.mulf %9, %9 : vector<64x1xf32>
    %16 = arith.subf %14, %15 : vector<64x1xf32>
    %17 = vector.broadcast %9 : vector<64x1xf32> to vector<64x128xf32>
    %18 = arith.subf %5, %17 : vector<64x128xf32>
    %cst_9 = arith.constant 9.99999997E-7 : f32
    %19 = vector.broadcast %cst_9 : f32 to vector<64x1xf32>
    %20 = arith.addf %16, %19 : vector<64x1xf32>
    %21 = math.rsqrt %20 : vector<64x1xf32>
    %22 = vector.broadcast %21 : vector<64x1xf32> to vector<64x128xf32>
    %23 = arith.mulf %18, %22 : vector<64x128xf32>
    %c0_10 = arith.constant 0 : index
    %c0_11 = arith.constant 0 : index
    %24 = vector.load %arg4[%c0_10, %c0_11] : memref<1x128xf32, #tpu.memory_space<vmem>>, vector<1x128xf32>
    %25 = vector.broadcast %24 : vector<1x128xf32> to vector<64x128xf32>
    %26 = arith.mulf %23, %25 : vector<64x128xf32>
    %c0_12 = arith.constant 0 : index
    %c0_13 = arith.constant 0 : index
    %27 = vector.load %arg5[%c0_12, %c0_13] : memref<1x128xf32, #tpu.memory_space<vmem>>, vector<1x128xf32>
    %28 = vector.broadcast %27 : vector<1x128xf32> to vector<64x128xf32>
    %29 = arith.addf %26, %28 : vector<64x128xf32>
    %30 = arith.truncf %29 : vector<64x128xf32> to vector<64x128xbf16>
    %c0_14 = arith.constant 0 : index
    %c0_15 = arith.constant 0 : index
    %31 = vector.load %arg6[%c0_14, %c0_15] : memref<128x128xbf16, #tpu.memory_space<vmem>>, vector<128x128xbf16>
    %cst_16 = arith.constant dense<0.000000e+00> : vector<64x128xf32>
    %32 = tpu.matmul %30, %31, %cst_16 {dimension_numbers = #tpu.dot_dimension_numbers<[1], [0], [0], [1], [0, 0, 1, 1], [], []>} : vector<64x128xbf16>, vector<128x128xbf16>, vector<64x128xf32> -> vector<64x128xf32>
    %c0_17 = arith.constant 0 : index
    %c0_18 = arith.constant 0 : index
    %33 = vector.load %arg7[%c0_17, %c0_18] : memref<1x128xf32, #tpu.memory_space<vmem>>, vector<1x128xf32>
    %34 = vector.broadcast %33 : vector<1x128xf32> to vector<64x128xf32>
    %35 = arith.addf %32, %34 : vector<64x128xf32>
    %36 = arith.mulf %35, %35 : vector<64x128xf32>
    %37 = arith.mulf %35, %36 : vector<64x128xf32>
    %cst_19 = arith.constant 4.471500e-02 : f32
    %38 = vector.broadcast %cst_19 : f32 to vector<64x128xf32>
    %39 = arith.mulf %38, %37 : vector<64x128xf32>
    %40 = arith.addf %35, %39 : vector<64x128xf32>
    %cst_20 = arith.constant 0.797884583 : f32
    %41 = vector.broadcast %cst_20 : f32 to vector<64x128xf32>
    %42 = arith.mulf %41, %40 : vector<64x128xf32>
    %43 = math.tanh %42 : vector<64x128xf32>
    %cst_21 = arith.constant 1.000000e+00 : f32
    %44 = vector.broadcast %cst_21 : f32 to vector<64x128xf32>
    %45 = arith.addf %44, %43 : vector<64x128xf32>
    %cst_22 = arith.constant 5.000000e-01 : f32
    %46 = vector.broadcast %cst_22 : f32 to vector<64x128xf32>
    %47 = arith.mulf %46, %45 : vector<64x128xf32>
    %48 = arith.mulf %35, %47 : vector<64x128xf32>
    %49 = arith.truncf %48 : vector<64x128xf32> to vector<64x128xbf16>
    %c0_23 = arith.constant 0 : index
    %c0_24 = arith.constant 0 : index
    %50 = vector.load %arg8[%c0_23, %c0_24] : memref<128x128xbf16, #tpu.memory_space<vmem>>, vector<128x128xbf16>
    %cst_25 = arith.constant dense<0.000000e+00> : vector<64x128xf32>
    %51 = tpu.matmul %49, %50, %cst_25 {dimension_numbers = #tpu.dot_dimension_numbers<[1], [0], [0], [1], [0, 0, 1, 1], [], []>} : vector<64x128xbf16>, vector<128x128xbf16>, vector<64x128xf32> -> vector<64x128xf32>
    %c0_26 = arith.constant 0 : index
    %c0_27 = arith.constant 0 : index
    %52 = vector.load %arg9[%c0_26, %c0_27] : memref<1x128xf32, #tpu.memory_space<vmem>>, vector<1x128xf32>
    %53 = vector.broadcast %52 : vector<1x128xf32> to vector<64x128xf32>
    %54 = arith.addf %51, %53 : vector<64x128xf32>
    %55 = arith.addf %5, %54 : vector<64x128xf32>
    %56 = arith.truncf %55 : vector<64x128xf32> to vector<64x128xbf16>
    %c0_28 = arith.constant 0 : index
    %c0_29 = arith.constant 0 : index
    %57 = vector.load %arg10[%c0_28, %c0_29] : memref<64x128xbf16, #tpu.memory_space<vmem>>, vector<64x128xbf16>
    tpu.vector_store %arg10[%c0_28, %c0_29], %56 {strides = array<i32>} : memref<64x128xbf16, #tpu.memory_space<vmem>>, vector<64x128xbf16>,
    return
  }
  func.func @transform_0(%arg0: i32) -> (i32, i32) {
    %c0_i32 = arith.constant 0 : i32
    %c0_i32_0 = arith.constant 0 : i32
    return %arg0, %c0_i32 : i32, i32
  }
  func.func @transform_1(%arg0: i32) -> (i32, i32) {
    %c0_i32 = arith.constant 0 : i32
    %c0_i32_0 = arith.constant 0 : i32
    %c0_i32_1 = arith.constant 0 : i32
    return %c0_i32, %c0_i32_0 : i32, i32
  }
  func.func @transform_2(%arg0: i32) -> (i32, i32) {
    %c0_i32 = arith.constant 0 : i32
    %c0_i32_0 = arith.constant 0 : i32
    %c0_i32_1 = arith.constant 0 : i32
    return %c0_i32, %c0_i32_0 : i32, i32
  }
  func.func @transform_3(%arg0: i32) -> (i32, i32) {
    %c0_i32 = arith.constant 0 : i32
    %c0_i32_0 = arith.constant 0 : i32
    %c0_i32_1 = arith.constant 0 : i32
    return %c0_i32, %c0_i32_0 : i32, i32
  }
  func.func @transform_4(%arg0: i32) -> (i32, i32) {
    %c0_i32 = arith.constant 0 : i32
    %c0_i32_0 = arith.constant 0 : i32
    %c0_i32_1 = arith.constant 0 : i32
    return %c0_i32, %c0_i32_0 : i32, i32
  }
  func.func @transform_5(%arg0: i32) -> (i32, i32) {
    %c0_i32 = arith.constant 0 : i32
    %c0_i32_0 = arith.constant 0 : i32
    %c0_i32_1 = arith.constant 0 : i32
    return %c0_i32, %c0_i32_0 : i32, i32
  }
  func.func @transform_6(%arg0: i32) -> (i32, i32) {
    %c0_i32 = arith.constant 0 : i32
    %c0_i32_0 = arith.constant 0 : i32
    %c0_i32_1 = arith.constant 0 : i32
    return %c0_i32, %c0_i32_0 : i32, i32
  }
  func.func @transform_7(%arg0: i32) -> (i32, i32) {
    %c0_i32 = arith.constant 0 : i32
    %c0_i32_0 = arith.constant 0 : i32
    %c0_i32_1 = arith.constant 0 : i32
    return %c0_i32, %c0_i32_0 : i32, i32
  }
  func.func @transform_8(%arg0: i32) -> (i32, i32) {
    %c0_i32 = arith.constant 0 : i32
    %c0_i32_0 = arith.constant 0 : i32
    %c0_i32_1 = arith.constant 0 : i32
    return %c0_i32, %c0_i32_0 : i32, i32
  }
  func.func @transform_9(%arg0: i32) -> (i32, i32) {
    %c0_i32 = arith.constant 0 : i32
    %c0_i32_0 = arith.constant 0 : i32
    return %arg0, %c0_i32 : i32, i32
  }
}

</mosaic_0001>

<bundles_post_ra>
// kernel: tpu_custom_call.1
= control target key start
LH: loop header
LB: loop body
LE: loop exit
PB: predicated region body
PF: predicated region fallthrough
CT: control target
= control target key end

     0   :  { %s2169_s0 = inlined_call_operand.hbm [shape: bf16[128,128], index: 0, kind: input, shape index: {}]   ;;  %s2170_s1 = inlined_call_operand.hbm [shape: bf16[128,128], index: 1, kind: input, shape index: {}]   ;;  %s2171_s2 = inlined_call_operand.vmem [shape: f32[1,128], index: 2, kind: input, shape index: {}]   ;;  %s2172_s3 = inlined_call_operand.vmem [shape: f32[1,128], index: 3, kind: input, shape index: {}]   ;;  %s2173_s4 = inlined_call_operand.vmem [shape: f32[1,128], index: 4, kind: input, shape index: {}]   ;;  %s2174_s5 = inlined_call_operand.hbm [shape: bf16[128,128], index: 5, kind: input, shape index: {}]   ;;  %s2175_s6 = inlined_call_operand.vmem [shape: f32[1,128], index: 6, kind: input, shape index: {}]   ;;  %s2176_s7 = inlined_call_operand.hbm [shape: bf16[128,128], index: 7, kind: input, shape index: {}]   ;;  %s2177_s8 = inlined_call_operand.vmem [shape: f32[1,128], index: 8, kind: input, shape index: {}]   ;;  %s2178_s9 = inlined_call_operand.hbm [shape: bf16[128,128], index: 9, kind: output, shape index: {}]  }
   0x1   :  { %2185 = sst [smem:[#allocation15_spill]] %s2170_s1 }
   0x2   :  { %2186 = sst [smem:[#allocation16_spill]] %s2174_s5 }
   0x3   :  { %2187 = sst [smem:[#allocation17_spill]] %s2176_s7 }
   0x4   :  { %14 = vsyncpa [#allocation3], 0 }
   0x5   :  { %16 = vsyncpa [#allocation3 + $0x1], 0 }
   0x6   :  { %17 = vsyncpa [#allocation6], 0 }
   0x7   :  { %18 = vsyncpa [#allocation9], 0 }
   0x8   :  { %19 = vsyncpa [#allocation4], 0 }
   0x9   :  { %21 = vsyncpa [#allocation4 + $0x1], 0  ;;  %s1814_s30 = smov 0   ;;  %s1816_s10 = smov 0  }
   0xa   :  { %s1818_s11 = smov 0   ;;  %s1820_s12 = smov 0  }
   0xb LB: > { %s1835_s13 = sadd.s32 4294967295, %s1753_s12   ;;  %s1216_s14 = sadd.s32 4294967294, %s1753_s12   ;;  %s1753_s12 = sphi %s1820_s12, %s2211_s12   ;;  %s1749_s11 = sphi %s1818_s11, %s2210_s11   ;;  %s1745_s10 = sphi %s1816_s10, %s2209_s10   ;;  %s1741_s30 = sphi %s1814_s30, %s2208_s30  }
   0xc   : > { %p47_p0 = scmp.ne.s32.totalorder %s1745_s10, %s1741_s30  ;;  %p2179_p1 = scmp.eq.s32.totalorder %s1835_s13, 0 }
   0xd   : > { %p239_p2 = scmp.eq.s32.totalorder %s1835_s13, 1  ;;  %p245_p3 = scmp.eq.s32.totalorder %s1216_s14, 1 }
   0xe   : > { %p1844_p4 = por %p2179_p1, %p47_p0  ;;  %p1217_p5 = scmp.ge.s32.totalorder %s1753_s12, 1 }
   0xf   : > { %p1849_p6 = por %p245_p3, %p47_p0  ;;  %p252_p7 = scmp.lt.s32.totalorder %s1753_s12, 3 }
  0x10   : > { %s2188_s15 = scalar_select %p1844_p4, 1, 0 }
  0x11   : > { %s2189_s16 = scalar_select %p1849_p6, 1, 0 }
  0x12   : > { %p1854_p8 = pnand %p1217_p5, %p252_p7  ;;  %s1755_s18 = smov [#allocation5]  }
  0x13   : > { %s264_s19 = sshll.u32 %s1755_s18, 4  ;;  %s1756_s21 = smov [#allocation7]   ;;  %s265_s19 = int_to_ptr.vmem [resolvable:$true] %s264_s19 }
  0x14   : > { %s2190_s17 = scalar_select %p1854_p8, 1, 0 }
  0x15   : > { %p1450_p9 = pneg %p1854_p8  ;;  %s286_s22 = sshll.u32 %s1756_s21, 4  ;;  %s287_s22 = int_to_ptr.vmem [resolvable:$true] %s286_s22 }
  0x16   : > { %s1757_s23 = smov [#allocation8]   ;;  %s1586_s25 = scalar_lea.vmem %s265_s19, 1024 }
  0x17   : > { %p1863_p11 = pnand %p1450_p9, %p2179_p1  ;;  %s302_s24 = sshll.u32 %s1757_s23, 4  ;;  %s303_s24 = int_to_ptr.vmem [resolvable:$true] %s302_s24 }
  0x18   : > { %p1587_p13 = scmp.ne.s32.totalorder %s265_s19, %s1586_s25  ;;  %p1594_p5 = scmp.lt.s32.totalorder %s265_s19, %s265_s19 }
  0x19   : > { %p1577_p12 = pneg %p1863_p11  ;;  %p1595_p7 = scmp.lt.s32.totalorder %s1586_s25, %s1586_s25 }
  0x1b   : > { %p1589_p0 = pnand %p1587_p13, %p1577_p12  ;;  %p1596_p9 = por %p1595_p7, %p1594_p5 }
  0x1d   : > { %p1590_p3 = pneg %p1589_p0 }
  0x1f   : > { %p1597_p10 = pnand %p1596_p9, %p1590_p3 }
  0x21   : > { %1600 = shalt.err (!%p1597_p10)
}
  0x22   : > { %s2180_s26 = smov 64   ;;  %s2181_s27 = smov 4  }
  0x23   : > { %s2192_s1 = sld [smem:[#allocation15_spill]]  ;;  %s1612_s14 = scalar_lea.vmem %s287_s22, 1024 }
  0x24   : > { %p1613_p13 = scmp.ne.s32.totalorder %s287_s22, %s1612_s14  ;;  %p1620_p3 = scmp.lt.s32.totalorder %s287_s22, %s287_s22 }
  0x25   : > { %p1621_p10 = scmp.lt.s32.totalorder %s1612_s14, %s1612_s14 }
  0x26   : > { %p1615_p0 = pnand %p1613_p13, %p1577_p12 }
  0x27   : > { %p1622_p7 = por %p1621_p10, %p1620_p3 }
  0x28   : > { %p1616_p5 = pneg %p1615_p0 }
  0x29   : > { %1453 = dma.hbm_to_vmem [thread:$0]  (!%p1863_p11), %s2192_s1, 1024, %s265_s19, [#allocation6], %s2180_s26, %s2180_s26, %s2181_s27  }
  0x2a   : > { %p1623_p9 = pnand %p1622_p7, %p1616_p5 }
  0x2c   : > { %1626 = shalt.err (!%p1623_p9)
}
  0x2d   : > { %s2193_s5 = sld [smem:[#allocation16_spill]]  ;;  %s1638_s19 = scalar_lea.vmem %s303_s24, 1024 }
  0x2e   : > { %p1639_p1 = scmp.ne.s32.totalorder %s303_s24, %s1638_s19  ;;  %p1646_p3 = scmp.lt.s32.totalorder %s303_s24, %s303_s24 }
  0x2f   : > { %p1647_p5 = scmp.lt.s32.totalorder %s1638_s19, %s1638_s19 }
  0x30   : > { %p1641_p13 = pnand %p1639_p1, %p1577_p12 }
  0x31   : > { %p1648_p10 = por %p1647_p5, %p1646_p3 }
  0x32   : > { %p1642_p0 = pneg %p1641_p13 }
  0x33   : > { %1456 = dma.hbm_to_vmem [thread:$0]  (!%p1863_p11), %s2193_s5, 1024, %s287_s22, [#allocation6], %s2180_s26, %s2180_s26, %s2181_s27  }
  0x34   : > { %p1649_p7 = pnand %p1648_p10, %p1642_p0 }
  0x36   : > { %1652 = shalt.err (!%p1649_p7)
}
  0x37   : > { %s2194_s7 = sld [smem:[#allocation17_spill]]  ;;  %s1903_s22 = sadd.s32 1, %s1753_s12  }
  0x38   : > { %s31_s20 = ssub.s32 %s1753_s12, %s1903_s22  ;;  %s34_s28 = sadd.s32 1, %s1749_s11 }
  0x39   : > { %p32_p1 = scmp.eq.s32.totalorder %s31_s20, 0  ;;  %p41_p12 = scmp.ne.s32.totalorder %s1749_s11, %s1745_s10 }
  0x3a   : > { %p42_p9 = scmp.eq.s32.totalorder %s1753_s12, 0  ;;  %p1471_p13 = scmp.lt.s32.totalorder %s1753_s12, 2 }
  0x3b   : > { %s1913_s29 = scalar_select %p32_p1, %s1749_s11, %s34_s28  }
  0x3c   : > { %p43_p0 = por %p42_p9, %p41_p12  ;;  %p1917_p3 = por %p239_p2, %p41_p12 }
  0x3d   : > { %1459 = dma.hbm_to_vmem [thread:$0]  (!%p1863_p11), %s2194_s7, 1024, %s303_s24, [#allocation9], %s2180_s26, %s2180_s26, %s2181_s27  }
  0x3e   : > { %s2195_s14 = scalar_select %p1917_p3, 1, 0 }
  0x3f   : > { %s319_s18 = sand.u32 1, %s1749_s11   ;;  %s1277_s21 = sshll.u32 %s1753_s12, 9 }
  0x40   : > { %s1222_s24 = sshll.u32 %s319_s18, 5  ;;  %s1926_s25 = scalar_lea.hbm %s2169_s0, %s1277_s21 }
  0x41   : > { %s323_s20 = scalar_lea.vmem [#allocation2], %s1222_s24  ;;  %p1928_p11 = pnand %p1471_p13, %p43_p0 }
  0x42   : > { %s330_s28 = sshll.u32 %s323_s20, 4  ;;  %s1934_s27 = scalar_lea.sflag [#allocation3], %s319_s18  ;;  %s1932_s28 = int_to_ptr.vmem [resolvable:$true] %s330_s28 }
  0x43   : > { %s1653_s1 = scalar_lea.hbm %s1926_s25, 512  ;;  %p1655_p5 = pneg %p1928_p11 }
  0x44   : > { %p1654_p2 = scmp.ne.s32.totalorder %s1926_s25, %s1653_s1  ;;  %s1658_s24 = scalar_lea.hbm %s2169_s0, 1024 }
  0x45   : > { %p1659_p1 = scmp.lt.s32.totalorder %s1926_s25, %s2169_s0  ;;  %p1660_p12 = scmp.lt.s32.totalorder %s1658_s24, %s1653_s1 }
  0x46   : > { %p1656_p10 = pnand %p1655_p5, %p1654_p2 }
  0x47   : > { %p1661_p9 = por %p1660_p12, %p1659_p1 }
  0x48   : > { %p1657_p7 = pneg %p1656_p10 }
  0x4a   : > { %p1662_p13 = pnand %p1661_p9, %p1657_p7 }
  0x4c   : > { %1665 = shalt.err (!%p1662_p13)
}
  0x4d   : > { %s1666_s18 = scalar_lea.vmem %s1932_s28, 512  ;;  %s1760_s5 = smov [#allocation2]  }
  0x4e   : > { %p1667_p0 = scmp.ne.s32.totalorder %s1932_s28, %s1666_s18  ;;  %s1671_s7 = sshll.u32 %s1760_s5, 4  ;;  %s1672_s7 = int_to_ptr.vmem [resolvable:$false] %s1671_s7 }
  0x4f   : > { %s1673_s21 = scalar_lea.vmem %s1672_s7, 1024  ;;  %p1674_p10 = scmp.lt.s32.totalorder %s1932_s28, %s1672_s7 }
  0x50   : > { %p1669_p6 = pnand %p1667_p0, %p1655_p5  ;;  %p1675_p3 = scmp.lt.s32.totalorder %s1673_s21, %s1666_s18 }
  0x52   : > { %p1670_p2 = pneg %p1669_p6  ;;  %p1676_p4 = por %p1675_p3, %p1674_p10 }
  0x54   : > { %p1677_p8 = pnand %p1676_p4, %p1670_p2 }
  0x56   : > { %1680 = shalt.err (!%p1677_p8)
}
  0x57   : > { %s2197_s1 = smov 4   ;;  %s2198_s19 = smov 64  }
  0x58   : > { %1463 = dma.hbm_to_vmem [thread:$0]  (!%p1928_p11), %s1926_s25, 512, %s1932_s28, %s1934_s27, %s2198_s19, %s2198_s19, %s2197_s1  }
  0x59   : > { %p2199_p6 = scmp.ne.s32.totalorder %s2190_s17, 0 }
  0x5a   : > { %s1961_s5 = sand.u32 (!%p2199_p6), 1, %s1745_s10   ;;  %p2200_p4 = scmp.ne.s32.totalorder (!%p2199_p6), %s2188_s15, 0 }
  0x5b   : > { %342 = sbr.rel (%p2199_p6) target bundleno = 981 (0x3d5), region = 56  ;;  %s1226_s7 = sshll.u32 (!%p2199_p6), %s1961_s5, 5 }
  0x5c   : > { %s345_s24 = scalar_lea.sflag (!%p2199_p6), [#allocation3], %s1961_s5  ;;  %s1967_s26 = scalar_lea.vmem (!%p2199_p6), [#allocation2], %s1226_s7 }
  0x60   : > { %1724 = dma.done.wait (%p2200_p4), %s345_s24, 512  }
  0x61   : > { %1726 = vsyncadd (%p2200_p4), %s345_s24, 4294966784  ;;  %p2201_p8 = scmp.eq.s32.totalorder %s1835_s13, 0 }
  0x63   : > { %1728 = dma.done.wait (%p2201_p8), [#allocation6], 2048   ;;  %p2202_p3 = pmov %p2201_p8 }
  0x65   : > { %1730 = vsyncadd (%p2202_p3), [#allocation6], 4294965248  ;;  %p2203_p11 = pmov %p2202_p3 }
  0x66   : > { %p2204_p5 = pmov %p2202_p3 }
  0x67   : > { %1732 = dma.done.wait (%p2203_p11), [#allocation9], 1024  }
  0x68   : > { %1734 = vsyncadd (%p2204_p5), [#allocation9], 4294966272  ;;  %v1515_v0 = vld [vmem:[#allocation5 + $0x38] sm:$0xff]   ;;  %v1516_v1 = vld [vmem:[#allocation5 + $0x30] sm:$0xff]   ;;  %s394_s19 = scalar_lea.vmem [#allocation10], %s1226_s7  ;;  %s1101_s27 = scalar_lea.sflag [#allocation4], %s1961_s5 }
  0x69   : > { %1346 = vmatprep.subr.bf16.mxu0 %v1515_v0  ;;  %v1517_v2 = vld [vmem:[#allocation5 + $0x28] sm:$0xff]   ;;  %v1518_v3 = vld [vmem:[#allocation5 + $0x20] sm:$0xff]   ;;  %v1519_v5 = vld [vmem:[#allocation5 + $0x18] sm:$0xff]   ;;  %s1114_s24 = sshll.u32 %s394_s19, 4  ;;  %p2205_p1 = scmp.ne.s32.totalorder %s2195_s14, 0  ;;  %s2119_s24 = int_to_ptr.vmem [resolvable:$true] %s1114_s24 }
  0x6a   : > { %1347 = vmatpush3.bf16.msra.mxu0 %v1515_v0  ;;  %v1523_v4 = vld [vmem:[%s1967_s26] sm:$0xff]   ;;  %v1520_v6 = vld [vmem:[#allocation5 + $0x10] sm:$0xff]   ;;  %v1521_v7 = vld [vmem:[#allocation5 + $0x8] sm:$0xff]   ;;  %s1761_s25 = smov [#allocation10]  }
  0x6b   : > { %1348 = vmatprep.subr.bf16.mxu0 %v1516_v1  ;;  %1362 = vmatprep.mubr.bf16.mxu0 %v1523_v4  ;;  %v1522_v8 = vld [vmem:[#allocation5] sm:$0xff]   ;;  %v1524_v9 = vld [vmem:[%s1967_s26 + $0x8] sm:$0xff]   ;;  %v1525_v10 = vld [vmem:[%s1967_s26 + $0x10] sm:$0xff]   ;;  %s1685_s28 = sshll.u32 %s1761_s25, 4  ;;  %s1686_s28 = int_to_ptr.vmem [resolvable:$false] %s1685_s28 }
  0x6c   : > { %v1526_v11 = vld [vmem:[%s1967_s26 + $0x18] sm:$0xff]   ;;  %v1231_v12 = vld [vmem:[%s2171_s2] ss:$0 sm:$0xff]  ;;  %v1528_v36 = vld [vmem:[#allocation7 + $0x30] sm:$0xff]   ;;  %s1286_s26 = sshll.u32 %s1835_s13, 9  ;;  %s1681_s13 = scalar_lea.vmem %s2119_s24, 512 }
  0x6d   : > { %v1527_v33 = vld [vmem:[#allocation7 + $0x38] sm:$0xff]   ;;  %v1529_v39 = vld [vmem:[#allocation7 + $0x28] sm:$0xff]   ;;  %v1530_v40 = vld [vmem:[#allocation7 + $0x20] sm:$0xff]   ;;  %s2126_s17 = scalar_lea.hbm %s2178_s9, %s1286_s26  ;;  %p1682_p7 = scmp.ne.s32.totalorder %s2119_s24, %s1681_s13 }
  0x6e   : > { %1349 = vmatpush3.bf16.msra.mxu0 %v1516_v1  ;;  %1370 = vmatprep.subr.bf16.mxu1 %v1527_v33  ;;  %v1531_v41 = vld [vmem:[#allocation7 + $0x18] sm:$0xff]   ;;  %v1532_v42 = vld [vmem:[#allocation7 + $0x10] sm:$0xff]   ;;  %v1533_v43 = vld [vmem:[#allocation7 + $0x8] sm:$0xff]   ;;  %s1687_s23 = scalar_lea.vmem %s1686_s28, 1024  ;;  %p1688_p13 = scmp.lt.s32.totalorder %s2119_s24, %s1686_s28 }
  0x6f   : > { %1350 = vmatprep.subr.bf16.mxu0 %v1517_v2  ;;  %1371 = vmatpush3.bf16.msra.mxu1 %v1527_v33  ;;  %v1534_v44 = vld [vmem:[#allocation7] sm:$0xff]   ;;  %p1683_p12 = pnand %p1682_p7, %p2205_p1  ;;  %p1689_p0 = scmp.lt.s32.totalorder %s1687_s23, %s1681_s13 }
  0x70   : > { %1372 = vmatprep.subr.bf16.mxu1 %v1528_v36 }
  0x71   : > { %p1684_p9 = pneg %p1683_p12  ;;  %p1690_p2 = por %p1689_p0, %p1688_p13 }
  0x72   : > { %1351 = vmatpush3.bf16.msra.mxu0 %v1517_v2 }
  0x73   : > { %1352 = vmatprep.subr.bf16.mxu0 %v1518_v3  ;;  %1373 = vmatpush3.bf16.msra.mxu1 %v1528_v36  ;;  %p1691_p10 = pnand %p1690_p2, %p1684_p9 }
  0x74   : > { %1374 = vmatprep.subr.bf16.mxu1 %v1529_v39 }
  0x76   : > { %1353 = vmatpush3.bf16.msra.mxu0 %v1518_v3 }
  0x77   : > { %1354 = vmatprep.subr.bf16.mxu0 %v1519_v5  ;;  %1375 = vmatpush3.bf16.msra.mxu1 %v1529_v39 }
  0x78   : > { %1376 = vmatprep.subr.bf16.mxu1 %v1530_v40 }
  0x7a   : > { %1355 = vmatpush3.bf16.msra.mxu0 %v1519_v5 }
  0x7b   : > { %1356 = vmatprep.subr.bf16.mxu0 %v1520_v6  ;;  %1377 = vmatpush3.bf16.msra.mxu1 %v1530_v40 }
  0x7c   : > { %1378 = vmatprep.subr.bf16.mxu1 %v1531_v41 }
  0x7e   : > { %1357 = vmatpush3.bf16.msra.mxu0 %v1520_v6 }
  0x7f   : > { %1358 = vmatprep.subr.bf16.mxu0 %v1521_v7  ;;  %1379 = vmatpush3.bf16.msra.mxu1 %v1531_v41 }
  0x80   : > { %1380 = vmatprep.subr.bf16.mxu1 %v1532_v42 }
  0x82   : > { %1359 = vmatpush3.bf16.msra.mxu0 %v1521_v7 }
  0x83   : > { %1360 = vmatprep.subr.bf16.mxu0 %v1522_v8  ;;  %1381 = vmatpush3.bf16.msra.mxu1 %v1532_v42 }
  0x84   : > { %1382 = vmatprep.subr.bf16.mxu1 %v1533_v43 }
  0x86   : > { %1361 = vmatpush3.bf16.msra.mxu0 %v1522_v8 }
  0x87   : > { %1383 = vmatpush3.bf16.msra.mxu1 %v1533_v43 }
  0x88   : > { %1384 = vmatprep.subr.bf16.mxu1 %v1534_v44 }
  0x89   : > { %1363 = vmatmul.mubr.bf16.vlgmr.msra.gmra.mxu0 %v1524_v9 }
  0x8a   : > { %1366 = vmatprep.mubr.bf16.mxu0 %v1525_v10 }
  0x8b   : > { %1385 = vmatpush3.bf16.msra.mxu1 %v1534_v44 }
  0x91   : > { %1367 = vmatmul.mubr.bf16.gmra.mxu0 %v1526_v11 }
 0x149   : > { %v1364_v13 = vpop.f32.mrf.mxu0 }
 0x14a   : > { %v1988_v14 = vadd.f32 %v1364_v13, %v1231_v12 }
 0x14b   : > { %v535_v15 = vpop.f32.mrf.mxu0 }
 0x14c   : > { %v1990_v16 = vadd.f32 %v1231_v12, %v535_v15  ;;  %570 = vadd.xlane.f32.xlu1 %v1988_v14  ;;  %v592_v20 = vmul.f32 %v1988_v14, %v1988_v14 }
 0x14d   : > { %v1365_v17 = vpop.f32.mrf.mxu0 }
 0x14e   : > { %v1993_v18 = vadd.f32 %v1365_v17, %v1231_v12  ;;  %566 = vadd.xlane.f32.xlu0 %v1990_v16  ;;  %v590_v25 = vmul.f32 %v1990_v16, %v1990_v16 }
 0x14f   : > { %v538_v19 = vpop.f32.mrf.mxu0 }
 0x150   : > { %572 = vadd.xlane.f32.xlu1 %v1993_v18  ;;  %v1999_v22 = vadd.f32 %v1231_v12, %v538_v19  ;;  %v593_v23 = vmul.f32 %v1993_v18, %v1993_v18 }
 0x151   : > { %v1368_v21 = vpop.f32.mrf.mxu0 }
 0x152   : > { %602 = vadd.xlane.f32.xlu0 %v592_v20  ;;  %v591_v26 = vmul.f32 %v1999_v22, %v1999_v22  ;;  %v2010_v30 = vadd.f32 %v1368_v21, %v1231_v12 }
 0x153   : > { %v551_v24 = vpop.f32.mrf.mxu0 }
 0x154   : > { %604 = vadd.xlane.f32.xlu1 %v593_v23  ;;  %v2016_v32 = vadd.f32 %v1231_v12, %v551_v24  ;;  %v596_v38 = vmul.f32 %v2010_v30, %v2010_v30 }
 0x155   : > { %v1369_v27 = vpop.f32.mrf.mxu0 }
 0x156   : > { %598 = vadd.xlane.f32.xlu0 %v590_v25  ;;  %v2007_v28 = vadd.f32 %v1369_v27, %v1231_v12  ;;  %v594_v35 = vmul.f32 %v2016_v32, %v2016_v32 }
 0x157   : > { %v554_v29 = vpop.f32.mrf.mxu0 }
 0x158   : > { %600 = vadd.xlane.f32.xlu1 %v591_v26  ;;  %v2013_v31 = vadd.f32 %v1231_v12, %v554_v29  ;;  %v597_v37 = vmul.f32 %v2007_v28, %v2007_v28 }
 0x15a   : > { %568 = vadd.xlane.f32.xlu0 %v1999_v22  ;;  %v595_v34 = vmul.f32 %v2013_v31, %v2013_v31 }
 0x15c   : > { %580 = vadd.xlane.f32.xlu1 %v2007_v28 }
 0x15e   : > { %578 = vadd.xlane.f32.xlu0 %v2010_v30 }
 0x160   : > { %576 = vadd.xlane.f32.xlu1 %v2013_v31 }
 0x162   : > { %574 = vadd.xlane.f32.xlu0 %v2016_v32 }
 0x164   : > { %608 = vadd.xlane.f32.xlu1 %v595_v34 }
 0x166   : > { %606 = vadd.xlane.f32.xlu0 %v594_v35 }
 0x168   : > { %612 = vadd.xlane.f32.xlu1 %v597_v37 }
 0x16a   : > { %610 = vadd.xlane.f32.xlu0 %v596_v38 }
 0x1d5   : > { %v571_v45 = vpop.xlane.xlu1 %570 }
 0x1d6   : > { %v2028_v47 = vmul.f32 0.125, %v571_v45 }
 0x1d7   : > { %v567_v46 = vpop.xlane.xlu0 %566 }
 0x1d8   : > { %v2030_v51 = vmul.f32 0.125, %v567_v46  ;;  %v624_v53 = vmul.f32 %v2028_v47, %v2028_v47 }
 0x1d9   : > { %v573_v48 = vpop.xlane.xlu1 %572 }
 0x1da   : > { %v585_v49 = vmul.f32 0.125, %v573_v48  ;;  %v622_v59 = vmul.f32 %v2030_v51, %v2030_v51  ;;  %v638_v39 = vsub.f32 %v1990_v16, %v2030_v51  ;;  %v640_v48 = vsub.f32 %v1988_v14, %v2028_v47 }
 0x1db   : > { %v603_v50 = vpop.xlane.xlu0 %602 }
 0x1dc   : > { %v616_v52 = vmul.f32 0.125, %v603_v50  ;;  %v625_v55 = vmul.f32 %v585_v49, %v585_v49  ;;  %v641_v40 = vsub.f32 %v1993_v18, %v585_v49 }
 0x1dd   : > { %v605_v54 = vpop.xlane.xlu1 %604 }
 0x1de   : > { %v617_v56 = vmul.f32 0.125, %v605_v54  ;;  %v632_v57 = vsub.f32 %v616_v52, %v624_v53 }
 0x1df   : > { %v599_v58 = vpop.xlane.xlu0 %598 }
 0x1e0   : > { %v633_v60 = vsub.f32 %v617_v56, %v625_v55  ;;  %v614_v61 = vmul.f32 0.125, %v599_v58  ;;  %v648_v1 = vadd.f32 1e-06, %v632_v57  ;;  %v1244_v56 = vld [vmem:[%s2172_s3] ss:$0 sm:$0xff] }
 0x1e1   : > { %v601_v62 = vpop.xlane.xlu1 %600 }
 0x1e2   : > { %v649_v63 = vadd.f32 1e-06, %v633_v60  ;;  %v630_v0 = vsub.f32 %v614_v61, %v622_v59  ;;  %v615_v6 = vmul.f32 0.125, %v601_v62  ;;  %v1245_v62 = vld [vmem:[%s2173_s4] ss:$0 sm:$0xff] }
 0x1e3   : > { %v569_v2 = vpop.xlane.xlu0 %568 }
 0x1e4   : > { %v646_v3 = vadd.f32 1e-06, %v630_v0  ;;  %v583_v4 = vmul.f32 0.125, %v569_v2  ;;  %1543 = vrsqrt.f32 %v649_v63 }
 0x1e5   : > { %v581_v5 = vpop.xlane.xlu1 %580 }
 0x1e6   : > { %1545 = vrsqrt.f32 %v646_v3  ;;  %v623_v7 = vmul.f32 %v583_v4, %v583_v4  ;;  %v2036_v19 = vmul.f32 0.125, %v581_v5  ;;  %v639_v49 = vsub.f32 %v1999_v22, %v583_v4 }
 0x1e7   : > { %1547 = vrsqrt.f32 %v648_v1  ;;  %v579_v8 = vpop.xlane.xlu0 %578 }
 0x1e8   : > { %v631_v9 = vsub.f32 %v615_v6, %v623_v7  ;;  %v2038_v23 = vmul.f32 0.125, %v579_v8  ;;  %v629_v34 = vmul.f32 %v2036_v19, %v2036_v19 }
 0x1e9   : > { %v577_v10 = vpop.xlane.xlu1 %576 }
 0x1ea   : > { %v647_v11 = vadd.f32 1e-06, %v631_v9  ;;  %v587_v12 = vmul.f32 0.125, %v577_v10  ;;  %v628_v41 = vmul.f32 %v2038_v23, %v2038_v23  ;;  %v645_v10 = vsub.f32 %v2007_v28, %v2036_v19  ;;  %v1535_v19 = vld [vmem:[#allocation8 + $0x38] sm:$0xff]  }
 0x1eb   : > { %v575_v13 = vpop.xlane.xlu0 %574  ;;  %1394 = vmatprep.subr.bf16.mxu0 %v1535_v19  ;;  %1418 = vmatprep.subr.bf16.mxu1 %v1535_v19 }
 0x1ec   : > { %1549 = vrsqrt.f32 %v647_v11  ;;  %v586_v15 = vmul.f32 0.125, %v575_v13  ;;  %v627_v20 = vmul.f32 %v587_v12, %v587_v12  ;;  %v643_v3 = vsub.f32 %v2013_v31, %v587_v12  ;;  %1395 = vmatpush3.bf16.msra.mxu0 %v1535_v19 }
 0x1ed   : > { %v609_v17 = vpop.xlane.xlu1 %608 }
 0x1ee   : > { %v619_v21 = vmul.f32 0.125, %v609_v17  ;;  %v626_v25 = vmul.f32 %v586_v15, %v586_v15  ;;  %v642_v7 = vsub.f32 %v2016_v32, %v586_v15 }
 0x1ef   : > { %v607_v24 = vpop.xlane.xlu0 %606 }
 0x1f0   : > { %v635_v26 = vsub.f32 %v619_v21, %v627_v20  ;;  %v618_v27 = vmul.f32 0.125, %v607_v24  ;;  %v644_v20 = vsub.f32 %v2010_v30, %v2038_v23  ;;  %v1536_v23 = vld [vmem:[#allocation8 + $0x30] sm:$0xff]  }
 0x1f1   : > { %v613_v29 = vpop.xlane.xlu1 %612  ;;  %v1544_v33 = vpop.eup %1543  ;;  %1396 = vmatprep.subr.bf16.mxu0 %v1536_v23 }
 0x1f2   : > { %v651_v35 = vadd.f32 1e-06, %v635_v26  ;;  %v634_v36 = vsub.f32 %v618_v27, %v626_v25  ;;  %v621_v37 = vmul.f32 0.125, %v613_v29  ;;  %v665_v50 = vmul.f32 %v1544_v33, %v641_v40  ;;  %1397 = vmatpush3.bf16.msra.mxu0 %v1536_v23  ;;  %v1540_v40 = vld [vmem:[#allocation8 + $0x10] sm:$0xff]  }
 0x1f3   : > { %v1546_v38 = vpop.eup %1545  ;;  %v611_v42 = vpop.xlane.xlu0 %610 }
 0x1f4   : > { %v1548_v43 = vpop.eup %1547  ;;  %1551 = vrsqrt.f32 %v651_v35  ;;  %v650_v44 = vadd.f32 1e-06, %v634_v36  ;;  %v637_v45 = vsub.f32 %v621_v37, %v629_v34  ;;  %v620_v46 = vmul.f32 0.125, %v611_v42  ;;  %v1537_v37 = vld [vmem:[#allocation8 + $0x28] sm:$0xff]   ;;  %v1542_v42 = vld [vmem:[#allocation8] sm:$0xff]  }
 0x1f5   : > { %v662_v54 = vmul.f32 %v1546_v38, %v638_v39  ;;  %v664_v51 = vmul.f32 %v1548_v43, %v640_v48  ;;  %v680_v58 = vmul.f32 %v1244_v56, %v665_v50  ;;  %1398 = vmatprep.subr.bf16.mxu0 %v1537_v37  ;;  %v1538_v38 = vld [vmem:[#allocation8 + $0x20] sm:$0xff]   ;;  %v1539_v39 = vld [vmem:[#allocation8 + $0x18] sm:$0xff]  }
 0x1f6   : > { %1553 = vrsqrt.f32 %v650_v44  ;;  %v653_v52 = vadd.f32 1e-06, %v637_v45  ;;  %v636_v53 = vsub.f32 %v620_v46, %v628_v41  ;;  %1399 = vmatpush3.bf16.msra.mxu0 %v1537_v37  ;;  %v1541_v41 = vld [vmem:[#allocation8 + $0x8] sm:$0xff]   ;;  %v1246_v43 = vld [vmem:[%s2175_s6] ss:$0 sm:$0xff] }
 0x1f7   : > { %v677_v60 = vmul.f32 %v1244_v56, %v662_v54  ;;  %v679_v47 = vmul.f32 %v1244_v56, %v664_v51  ;;  %v695_v63 = vadd.f32 %v1245_v62, %v680_v58  ;;  %1400 = vmatprep.subr.bf16.mxu0 %v1538_v38 }
 0x1f8   : > { %1555 = vrsqrt.f32 %v653_v52  ;;  %v652_v55 = vadd.f32 1e-06, %v636_v53 }
 0x1f9   : > { %v1550_v57 = vpop.eup %1549  ;;  %v692_v0 = vadd.f32 %v1245_v62, %v677_v60  ;;  %v694_v2 = vadd.f32 %v1245_v62, %v679_v47 }
 0x1fa   : > { %v663_v59 = vmul.f32 %v1550_v57, %v639_v49  ;;  %1557 = vrsqrt.f32 %v652_v55  ;;  %1401 = vmatpush3.bf16.msra.mxu0 %v1538_v38 }
 0x1fb   : > { %v701_v6 = vpack.c.bf16 %v695_v63, %v694_v2  ;;  %1402 = vmatprep.subr.bf16.mxu0 %v1539_v39 }
 0x1fc   : > { %v678_v61 = vmul.f32 %v1244_v56, %v663_v59 }
 0x1fe   : > { %v693_v1 = vadd.f32 %v1245_v62, %v678_v61  ;;  %1403 = vmatpush3.bf16.msra.mxu0 %v1539_v39 }
 0x1ff   : > { %1404 = vmatprep.subr.bf16.mxu0 %v1540_v40 }
 0x200   : > { %v700_v4 = vpack.c.bf16 %v693_v1, %v692_v0 }
 0x201   : > { %v1552_v5 = vpop.eup %1551 }
 0x202   : > { %1386 = vmatprep.mubr.bf16.mxu1 %v700_v4  ;;  %v667_v8 = vmul.f32 %v1552_v5, %v643_v3  ;;  %1405 = vmatpush3.bf16.msra.mxu0 %v1540_v40 }
 0x203   : > { %v1554_v9 = vpop.eup %1553  ;;  %1387 = vmatmul.mubr.bf16.vlgmr.msra.gmra.mxu1 %v701_v6  ;;  %1406 = vmatprep.subr.bf16.mxu0 %v1541_v41 }
 0x204   : > { %v666_v11 = vmul.f32 %v1554_v9, %v642_v7  ;;  %v682_v13 = vmul.f32 %v1244_v56, %v667_v8  ;;  %1426 = vmatpush3.bf16.msra.mxu1 %v1535_v19 }
 0x205   : > { %v1556_v17 = vpop.eup %1555  ;;  %1419 = vmatprep.subr.bf16.mxu1 %v1536_v23 }
 0x206   : > { %v681_v21 = vmul.f32 %v1244_v56, %v666_v11  ;;  %v669_v12 = vmul.f32 %v1556_v17, %v645_v10  ;;  %v697_v26 = vadd.f32 %v1245_v62, %v682_v13  ;;  %1407 = vmatpush3.bf16.msra.mxu0 %v1541_v41 }
 0x207   : > { %v1558_v24 = vpop.eup %1557  ;;  %1408 = vmatprep.subr.bf16.mxu0 %v1542_v42 }
 0x208   : > { %v696_v25 = vadd.f32 %v1245_v62, %v681_v21  ;;  %v668_v27 = vmul.f32 %v1558_v24, %v644_v20  ;;  %v684_v15 = vmul.f32 %v1244_v56, %v669_v12  ;;  %1427 = vmatpush3.bf16.msra.mxu1 %v1536_v23 }
 0x209   : > { %1420 = vmatprep.subr.bf16.mxu1 %v1537_v37 }
 0x20a   : > { %v702_v29 = vpack.c.bf16 %v697_v26, %v696_v25  ;;  %v683_v33 = vmul.f32 %v1244_v56, %v668_v27  ;;  %v699_v35 = vadd.f32 %v1245_v62, %v684_v15  ;;  %1409 = vmatpush3.bf16.msra.mxu0 %v1542_v42 }
 0x20c   : > { %1390 = vmatprep.mubr.bf16.mxu1 %v702_v29  ;;  %v698_v34 = vadd.f32 %v1245_v62, %v683_v33  ;;  %1428 = vmatpush3.bf16.msra.mxu1 %v1537_v37 }
 0x20d   : > { %1421 = vmatprep.subr.bf16.mxu1 %v1538_v38 }
 0x20e   : > { %v703_v36 = vpack.c.bf16 %v699_v35, %v698_v34 }
 0x210   : > { %1391 = vmatmul.mubr.bf16.gmra.mxu1 %v703_v36 }
 0x211   : > { %1429 = vmatpush3.bf16.msra.mxu1 %v1538_v38 }
 0x212   : > { %1422 = vmatprep.subr.bf16.mxu1 %v1539_v39 }
 0x215   : > { %1430 = vmatpush3.bf16.msra.mxu1 %v1539_v39 }
 0x216   : > { %1423 = vmatprep.subr.bf16.mxu1 %v1540_v40 }
 0x219   : > { %1431 = vmatpush3.bf16.msra.mxu1 %v1540_v40 }
 0x21a   : > { %1424 = vmatprep.subr.bf16.mxu1 %v1541_v41 }
 0x21d   : > { %1432 = vmatpush3.bf16.msra.mxu1 %v1541_v41 }
 0x21e   : > { %1425 = vmatprep.subr.bf16.mxu1 %v1542_v42 }
 0x221   : > { %1433 = vmatpush3.bf16.msra.mxu1 %v1542_v42 }
 0x2c3   : > { %v1388_v44 = vpop.f32.mrf.mxu1 }
 0x2c4   : > { %v2065_v45 = vadd.f32 %v1388_v44, %v1246_v43 }
 0x2c5   : > { %v809_v46 = vpop.f32.mrf.mxu1 }
 0x2c6   : > { %v842_v48 = vmul.f32 %v2065_v45, %v2065_v45  ;;  %v2069_v50 = vadd.f32 %v1246_v43, %v809_v46 }
 0x2c7   : > { %v1389_v52 = vpop.f32.mrf.mxu1 }
 0x2c8   : > { %v850_v53 = vmul.f32 %v842_v48, %v2065_v45  ;;  %v840_v54 = vmul.f32 %v2069_v50, %v2069_v50  ;;  %v2074_v51 = vadd.f32 %v1389_v52, %v1246_v43 }
 0x2c9   : > { %v812_v49 = vpop.f32.mrf.mxu1 }
 0x2ca   : > { %v858_v55 = vmul.f32 0.044715, %v850_v53  ;;  %v848_v56 = vmul.f32 %v840_v54, %v2069_v50  ;;  %v843_v57 = vmul.f32 %v2074_v51, %v2074_v51  ;;  %v2079_v58 = vadd.f32 %v1246_v43, %v812_v49 }
 0x2cc   : > { %v866_v59 = vadd.f32 %v858_v55, %v2065_v45  ;;  %v856_v60 = vmul.f32 0.044715, %v848_v56  ;;  %v851_v47 = vmul.f32 %v843_v57, %v2074_v51  ;;  %v841_v61 = vmul.f32 %v2079_v58, %v2079_v58 }
 0x2ce   : > { %v874_v62 = vmul.f32 0.7978846, %v866_v59  ;;  %v864_v63 = vadd.f32 %v856_v60, %v2069_v50  ;;  %v859_v0 = vmul.f32 0.044715, %v851_v47  ;;  %v849_v1 = vmul.f32 %v841_v61, %v2079_v58 }
 0x2d0   : > { %v872_v2 = vmul.f32 0.7978846, %v864_v63  ;;  %v867_v3 = vadd.f32 %v859_v0, %v2074_v51  ;;  %v857_v4 = vmul.f32 0.044715, %v849_v1  ;;  %v1392_v5 = vpop.f32.mrf.mxu1  ;;  %1559 = vtanh.f32 %v874_v62 }
 0x2d1   : > { %v2088_v6 = vadd.f32 %v1392_v5, %v1246_v43 }
 0x2d2   : > { %1561 = vtanh.f32 %v872_v2  ;;  %v875_v7 = vmul.f32 0.7978846, %v867_v3  ;;  %v865_v8 = vadd.f32 %v857_v4, %v2079_v58  ;;  %v825_v9 = vpop.f32.mrf.mxu1 }
 0x2d3   : > { %v846_v10 = vmul.f32 %v2088_v6, %v2088_v6  ;;  %v2093_v11 = vadd.f32 %v1246_v43, %v825_v9 }
 0x2d4   : > { %1563 = vtanh.f32 %v875_v7  ;;  %v873_v13 = vmul.f32 0.7978846, %v865_v8  ;;  %v1393_v17 = vpop.f32.mrf.mxu1 }
 0x2d5   : > { %v854_v20 = vmul.f32 %v846_v10, %v2088_v6  ;;  %v844_v21 = vmul.f32 %v2093_v11, %v2093_v11  ;;  %v837_v12 = vadd.f32 %v1393_v17, %v1246_v43 }
 0x2d6   : > { %1565 = vtanh.f32 %v873_v13  ;;  %v828_v24 = vpop.f32.mrf.mxu1 }
 0x2d7   : > { %v862_v25 = vmul.f32 0.044715, %v854_v20  ;;  %v852_v26 = vmul.f32 %v844_v21, %v2093_v11  ;;  %v847_v27 = vmul.f32 %v837_v12, %v837_v12  ;;  %v829_v15 = vadd.f32 %v1246_v43, %v828_v24 }
 0x2d9   : > { %v870_v29 = vadd.f32 %v862_v25, %v2088_v6  ;;  %v860_v33 = vmul.f32 0.044715, %v852_v26  ;;  %v855_v34 = vmul.f32 %v847_v27, %v837_v12  ;;  %v845_v35 = vmul.f32 %v829_v15, %v829_v15  ;;  %v1255_v27 = vld [vmem:[%s2177_s8] ss:$0 sm:$0xff] }
 0x2db   : > { %v878_v36 = vmul.f32 0.7978846, %v870_v29  ;;  %v868_v19 = vadd.f32 %v860_v33, %v2093_v11  ;;  %v863_v23 = vmul.f32 0.044715, %v855_v34  ;;  %v853_v37 = vmul.f32 %v845_v35, %v829_v15 }
 0x2dd   : > { %v876_v38 = vmul.f32 0.7978846, %v868_v19  ;;  %v871_v39 = vadd.f32 %v863_v23, %v837_v12  ;;  %v861_v40 = vmul.f32 0.044715, %v853_v37  ;;  %v1560_v41 = vpop.eup %1559  ;;  %1567 = vtanh.f32 %v878_v36 }
 0x2de   : > { %v890_v52 = vadd.f32 1.0, %v1560_v41 }
 0x2df   : > { %v1562_v42 = vpop.eup %1561  ;;  %1569 = vtanh.f32 %v876_v38  ;;  %v879_v44 = vmul.f32 0.7978846, %v871_v39  ;;  %v869_v46 = vadd.f32 %v861_v40, %v829_v15 }
 0x2e0   : > { %v888_v43 = vadd.f32 1.0, %v1562_v42  ;;  %v898_v59 = vmul.f32 0.5, %v890_v52 }
 0x2e1   : > { %v1564_v48 = vpop.eup %1563  ;;  %1571 = vtanh.f32 %v879_v44  ;;  %v877_v53 = vmul.f32 0.7978846, %v869_v46 }
 0x2e2   : > { %v891_v54 = vadd.f32 1.0, %v1564_v48  ;;  %v896_v57 = vmul.f32 0.5, %v888_v43  ;;  %v906_v63 = vmul.f32 %v898_v59, %v2065_v45 }
 0x2e3   : > { %v1566_v49 = vpop.eup %1565  ;;  %1573 = vtanh.f32 %v877_v53 }
 0x2e4   : > { %v899_v55 = vmul.f32 0.5, %v891_v54  ;;  %v889_v56 = vadd.f32 1.0, %v1566_v49  ;;  %v904_v61 = vmul.f32 %v896_v57, %v2069_v50 }
 0x2e6   : > { %v897_v60 = vmul.f32 0.5, %v889_v56  ;;  %v907_v47 = vmul.f32 %v899_v55, %v2074_v51 }
 0x2e8   : > { %v905_v62 = vmul.f32 %v897_v60, %v2079_v58  ;;  %v913_v2 = vpack.c.bf16 %v907_v47, %v906_v63 }
 0x2ea   : > { %v912_v0 = vpack.c.bf16 %v905_v62, %v904_v61  ;;  %v1568_v1 = vpop.eup %1567 }
 0x2eb   : > { %v894_v7 = vadd.f32 1.0, %v1568_v1 }
 0x2ec   : > { %v1570_v3 = vpop.eup %1569  ;;  %1410 = vmatprep.mubr.bf16.mxu0 %v912_v0 }
 0x2ed   : > { %1411 = vmatmul.mubr.bf16.vlgmr.msra.gmra.mxu0 %v913_v2  ;;  %v892_v4 = vadd.f32 1.0, %v1570_v3  ;;  %v902_v17 = vmul.f32 0.5, %v894_v7 }
 0x2ee   : > { %v1572_v5 = vpop.eup %1571 }
 0x2ef   : > { %v895_v8 = vadd.f32 1.0, %v1572_v5  ;;  %v900_v51 = vmul.f32 0.5, %v892_v4  ;;  %v910_v21 = vmul.f32 %v902_v17, %v2088_v6 }
 0x2f0   : > { %v1574_v9 = vpop.eup %1573 }
 0x2f1   : > { %v903_v10 = vmul.f32 0.5, %v895_v8  ;;  %v893_v13 = vadd.f32 1.0, %v1574_v9  ;;  %v908_v58 = vmul.f32 %v900_v51, %v2093_v11 }
 0x2f3   : > { %v901_v50 = vmul.f32 0.5, %v893_v13  ;;  %v911_v20 = vmul.f32 %v903_v10, %v837_v12 }
 0x2f5   : > { %v909_v45 = vmul.f32 %v901_v50, %v829_v15  ;;  %v915_v25 = vpack.c.bf16 %v911_v20, %v910_v21 }
 0x2f7   : > { %v914_v24 = vpack.c.bf16 %v909_v45, %v908_v58 }
 0x2f9   : > { %1414 = vmatprep.mubr.bf16.mxu1 %v914_v24 }
 0x2fa   : > { %1415 = vmatmul.mubr.bf16.vlgmr.msra.gmra.mxu1 %v915_v25 }
 0x3ad   : > { %v1412_v26 = vpop.f32.mrf.mxu0 }
 0x3ae   : > { %v1030_v33 = vadd.f32 %v1412_v26, %v1255_v27 }
 0x3af   : > { %v1021_v29 = vpop.f32.mrf.mxu0 }
 0x3b0   : > { %v1022_v35 = vadd.f32 %v1255_v27, %v1021_v29  ;;  %v1054_v11 = vadd.f32 %v1030_v33, %v1988_v14 }
 0x3b1   : > { %v1413_v34 = vpop.f32.mrf.mxu0 }
 0x3b2   : > { %v1033_v12 = vadd.f32 %v1413_v34, %v1255_v27  ;;  %v1052_v19 = vadd.f32 %v1022_v35, %v1990_v16 }
 0x3b3   : > { %v1024_v36 = vpop.f32.mrf.mxu0 }
 0x3b4   : > { %v1055_v6 = vadd.f32 %v1033_v12, %v1993_v18  ;;  %v1025_v15 = vadd.f32 %v1255_v27, %v1024_v36 }
 0x3b6   : > { %v1295_v23 = vpack.c.bf16 %v1055_v6, %v1054_v11  ;;  %v1053_v37 = vadd.f32 %v1025_v15, %v1999_v22 }
 0x3b8   : > { %1307 = vst [vmem:[%s394_s19 + $0x8] sm:$0xff] %v1295_v23   ;;  %v1290_v38 = vpack.c.bf16 %v1053_v37, %v1052_v19 }
 0x3ba   : > { %1291 = vst [vmem:[%s394_s19] sm:$0xff] %v1290_v38   ;;  %v1416_v39 = vpop.f32.mrf.mxu1 }
 0x3bb   : > { %v1046_v41 = vadd.f32 %v1416_v39, %v1255_v27 }
 0x3bc   : > { %v1037_v40 = vpop.f32.mrf.mxu1 }
 0x3bd   : > { %v1038_v44 = vadd.f32 %v1255_v27, %v1037_v40  ;;  %v1058_v16 = vadd.f32 %v1046_v41, %v2010_v30 }
 0x3be   : > { %v1417_v42 = vpop.f32.mrf.mxu1 }
 0x3bf   : > { %v1049_v14 = vadd.f32 %v1417_v42, %v1255_v27  ;;  %v1056_v43 = vadd.f32 %v1038_v44, %v2016_v32 }
 0x3c0   : > { %v1040_v18 = vpop.f32.mrf.mxu1 }
 0x3c1   : > { %v1059_v22 = vadd.f32 %v1049_v14, %v2007_v28  ;;  %v1041_v46 = vadd.f32 %v1255_v27, %v1040_v18 }
 0x3c3   : > { %v1305_v48 = vpack.c.bf16 %v1059_v22, %v1058_v16  ;;  %v1057_v52 = vadd.f32 %v1041_v46, %v2013_v31 }
 0x3c5   : > { %1309 = vst [vmem:[%s394_s19 + $0x18] sm:$0xff] %v1305_v48   ;;  %v1300_v30 = vpack.c.bf16 %v1057_v52, %v1056_v43 }
 0x3c7   : > { %1308 = vst [vmem:[%s394_s19 + $0x10] sm:$0xff] %v1300_v30  }
 0x3c8   : > { %1694 = shalt.err (!%p1691_p10)
}
 0x3c9   : > { %s1695_s20 = scalar_lea.hbm %s2126_s17, 512  ;;  %s1699_s1 = scalar_lea.hbm %s2178_s9, 1024 }
 0x3ca   : > { %p1696_p6 = scmp.ne.s32.totalorder %s2126_s17, %s1695_s20  ;;  %p1700_p3 = scmp.lt.s32.totalorder %s2126_s17, %s2178_s9 }
 0x3cb   : > { %p1701_p11 = scmp.lt.s32.totalorder %s1699_s1, %s1695_s20 }
 0x3cc   : > { %p1697_p4 = pnand %p1696_p6, %p2205_p1 }
 0x3cd   : > { %p1702_p5 = por %p1701_p11, %p1700_p3 }
 0x3ce   : > { %p1698_p8 = pneg %p1697_p4 }
 0x3d0   : > { %p1703_p7 = pnand %p1702_p5, %p1698_p8 }
 0x3d2   : > { %1706 = shalt.err (!%p1703_p7)
}
 0x3d3   : > { %s1762_s7 = smov 64   ;;  %s1763_s15 = smov 4  }
 0x3d4   : > { %1448 = dma.vmem_to_hbm [thread:$0]  (%p2205_p1), %s2119_s24, 512, %s2126_s17, %s1101_s27, %s1762_s7, %s1762_s7, %s1763_s15  }
 0x3d5 PF: > { %s1129_s13 = sand.u32 1, %s1741_s30   ;;  %p2206_p12 = scmp.ne.s32.totalorder %s2189_s16, 0 }
 0x3d6   : > { %p2207_p9 = scmp.ge.s32.totalorder %s1753_s12, 2  ;;  %s1130_s25 = scalar_lea.sflag [#allocation4], %s1129_s13 }
 0x3d8   : > { %p1465_p13 = pnand %p2207_p9, %p2206_p12 }
 0x3da   : > { %p1466_p0 = pneg %p1465_p13 }
 0x3dc   : > { %1736 = dma.done.wait (%p1466_p0), %s1130_s25, 512  }
 0x3dd   : > { %1738 = vsyncadd (%p1466_p0), %s1130_s25, 4294966784  ;;  %p24_p2 = scmp.ge.s32.totalorder %s1903_s22, 4   ;;  %s2208_s30 = smov %s1745_s10 }
 0x3de   : > { %s2209_s10 = smov %s1749_s11  ;;  %s2210_s11 = smov %s1913_s29 }
 0x3df   : > { %s2211_s12 = smov %s1903_s22  ;;  %26 = sbr.rel (!%p24_p2) target bundleno = 11 (0xb), region = 113 }
 0x3e4   :  { %1135 = vsyncpa [#allocation3], 1 }
 0x3e5   :  { %1137 = vsyncpa [#allocation3 + $0x1], 1 }
 0x3e6   :  { %1138 = vsyncpa [#allocation6], 1 }
 0x3e7   :  { %1139 = vsyncpa [#allocation9], 1 }
 0x3e8   :  { %1140 = vsyncpa [#allocation4], 1 }
 0x3e9   :  { %1142 = vsyncpa [#allocation4 + $0x1], 1 }

// kernel: tpu_custom_call.1
= control target key start
LH: loop header
LB: loop body
LE: loop exit
PB: predicated region body
PF: predicated region fallthrough
CT: control target
= control target key end

     0   :  { %s2169_s0 = inlined_call_operand.hbm [shape: bf16[128,128], index: 0, kind: input, shape index: {}]   ;;  %s2170_s1 = inlined_call_operand.hbm [shape: bf16[128,128], index: 1, kind: input, shape index: {}]   ;;  %s2171_s2 = inlined_call_operand.vmem [shape: f32[1,128], index: 2, kind: input, shape index: {}]   ;;  %s2172_s3 = inlined_call_operand.vmem [shape: f32[1,128], index: 3, kind: input, shape index: {}]   ;;  %s2173_s4 = inlined_call_operand.vmem [shape: f32[1,128], index: 4, kind: input, shape index: {}]   ;;  %s2174_s5 = inlined_call_operand.hbm [shape: bf16[128,128], index: 5, kind: input, shape index: {}]   ;;  %s2175_s6 = inlined_call_operand.vmem [shape: f32[1,128], index: 6, kind: input, shape index: {}]   ;;  %s2176_s7 = inlined_call_operand.hbm [shape: bf16[128,128], index: 7, kind: input, shape index: {}]   ;;  %s2177_s8 = inlined_call_operand.vmem [shape: f32[1,128], index: 8, kind: input, shape index: {}]   ;;  %s2178_s9 = inlined_call_operand.hbm [shape: bf16[128,128], index: 9, kind: output, shape index: {}]  }
   0x1   :  { %2185 = sst [smem:[#allocation15_spill]] %s2170_s1 }
   0x2   :  { %2186 = sst [smem:[#allocation16_spill]] %s2174_s5 }
   0x3   :  { %2187 = sst [smem:[#allocation17_spill]] %s2176_s7 }
   0x4   :  { %14 = vsyncpa [#allocation3], 0 }
   0x5   :  { %16 = vsyncpa [#allocation3 + $0x1], 0 }
   0x6   :  { %17 = vsyncpa [#allocation6], 0 }
   0x7   :  { %18 = vsyncpa [#allocation9], 0 }
   0x8   :  { %19 = vsyncpa [#allocation4], 0 }
   0x9   :  { %21 = vsyncpa [#allocation4 + $0x1], 0  ;;  %s1814_s30 = smov 0   ;;  %s1816_s10 = smov 0  }
   0xa   :  { %s1818_s11 = smov 0   ;;  %s1820_s12 = smov 0  }
   0xb LB: > { %s1835_s13 = sadd.s32 4294967295, %s1753_s12   ;;  %s1216_s14 = sadd.s32 4294967294, %s1753_s12   ;;  %s1753_s12 = sphi %s1820_s12, %s2211_s12   ;;  %s1749_s11 = sphi %s1818_s11, %s2210_s11   ;;  %s1745_s10 = sphi %s1816_s10, %s2209_s10   ;;  %s1741_s30 = sphi %s1814_s30, %s2208_s30  }
   0xc   : > { %p47_p0 = scmp.ne.s32.totalorder %s1745_s10, %s1741_s30  ;;  %p2179_p1 = scmp.eq.s32.totalorder %s1835_s13, 0 }
   0xd   : > { %p239_p2 = scmp.eq.s32.totalorder %s1835_s13, 1  ;;  %p245_p3 = scmp.eq.s32.totalorder %s1216_s14, 1 }
   0xe   : > { %p1844_p4 = por %p2179_p1, %p47_p0  ;;  %p1217_p5 = scmp.ge.s32.totalorder %s1753_s12, 1 }
   0xf   : > { %p1849_p6 = por %p245_p3, %p47_p0  ;;  %p252_p7 = scmp.lt.s32.totalorder %s1753_s12, 3 }
  0x10   : > { %s2188_s15 = scalar_select %p1844_p4, 1, 0 }
  0x11   : > { %s2189_s16 = scalar_select %p1849_p6, 1, 0 }
  0x12   : > { %p1854_p8 = pnand %p1217_p5, %p252_p7  ;;  %s1755_s18 = smov [#allocation5]  }
  0x13   : > { %s264_s19 = sshll.u32 %s1755_s18, 4  ;;  %s1756_s21 = smov [#allocation7]   ;;  %s265_s19 = int_to_ptr.vmem [resolvable:$true] %s264_s19 }
  0x14   : > { %s2190_s17 = scalar_select %p1854_p8, 1, 0 }
  0x15   : > { %p1450_p9 = pneg %p1854_p8  ;;  %s286_s22 = sshll.u32 %s1756_s21, 4  ;;  %s287_s22 = int_to_ptr.vmem [resolvable:$true] %s286_s22 }
  0x16   : > { %s1757_s23 = smov [#allocation8]   ;;  %s1586_s25 = scalar_lea.vmem %s265_s19, 1024 }
  0x17   : > { %p1863_p11 = pnand %p1450_p9, %p2179_p1  ;;  %s302_s24 = sshll.u32 %s1757_s23, 4  ;;  %s303_s24 = int_to_ptr.vmem [resolvable:$true] %s302_s24 }
  0x18   : > { %p1587_p13 = scmp.ne.s32.totalorder %s265_s19, %s1586_s25  ;;  %p1594_p5 = scmp.lt.s32.totalorder %s265_s19, %s265_s19 }
  0x19   : > { %p1577_p12 = pneg %p1863_p11  ;;  %p1595_p7 = scmp.lt.s32.totalorder %s1586_s25, %s1586_s25 }
  0x1b   : > { %p1589_p0 = pnand %p1587_p13, %p1577_p12  ;;  %p1596_p9 = por %p1595_p7, %p1594_p5 }
  0x1d   : > { %p1590_p3 = pneg %p1589_p0 }
  0x1f   : > { %p1597_p10 = pnand %p1596_p9, %p1590_p3 }
  0x21   : > { %1600 = shalt.err (!%p1597_p10)
}
  0x22   : > { %s2180_s26 = smov 64   ;;  %s2181_s27 = smov 4  }
  0x23   : > { %s2192_s1 = sld [smem:[#allocation15_spill]]  ;;  %s1612_s14 = scalar_lea.vmem %s287_s22, 1024 }
  0x24   : > { %p1613_p13 = scmp.ne.s32.totalorder %s287_s22, %s1612_s14  ;;  %p1620_p3 = scmp.lt.s32.totalorder %s287_s22, %s287_s22 }
  0x25   : > { %p1621_p10 = scmp.lt.s32.totalorder %s1612_s14, %s1612_s14 }
  0x26   : > { %p1615_p0 = pnand %p1613_p13, %p1577_p12 }
  0x27   : > { %p1622_p7 = por %p1621_p10, %p1620_p3 }
  0x28   : > { %p1616_p5 = pneg %p1615_p0 }
  0x29   : > { %1453 = dma.hbm_to_vmem [thread:$0]  (!%p1863_p11), %s2192_s1, 1024, %s265_s19, [#allocation6], %s2180_s26, %s2180_s26, %s2181_s27  }
  0x2a   : > { %p1623_p9 = pnand %p1622_p7, %p1616_p5 }
  0x2c   : > { %1626 = shalt.err (!%p1623_p9)
}
  0x2d   : > { %s2193_s5 = sld [smem:[#allocation16_spill]]  ;;  %s1638_s19 = scalar_lea.vmem %s303_s24, 1024 }
  0x2e   : > { %p1639_p1 = scmp.ne.s32.totalorder %s303_s24, %s1638_s19  ;;  %p1646_p3 = scmp.lt.s32.totalorder %s303_s24, %s303_s24 }
  0x2f   : > { %p1647_p5 = scmp.lt.s32.totalorder %s1638_s19, %s1638_s19 }
  0x30   : > { %p1641_p13 = pnand %p1639_p1, %p1577_p12 }
  0x31   : > { %p1648_p10 = por %p1647_p5, %p1646_p3 }
  0x32   : > { %p1642_p0 = pneg %p1641_p13 }
  0x33   : > { %1456 = dma.hbm_to_vmem [thread:$0]  (!%p1863_p11), %s2193_s5, 1024, %s287_s22, [#allocation6], %s2180_s26, %s2180_s26, %s2181_s27  }
  0x34   : > { %p1649_p7 = pnand %p1648_p10, %p1642_p0 }
  0x36   : > { %1652 = shalt.err (!%p1649_p7)
}
  0x37   : > { %s2194_s7 = sld [smem:[#allocation17_spill]]  ;;  %s1903_s22 = sadd.s32 1, %s1753_s12  }
  0x38   : > { %s31_s20 = ssub.s32 %s1753_s12, %s1903_s22  ;;  %s34_s28 = sadd.s32 1, %s1749_s11 }
  0x39   : > { %p32_p1 = scmp.eq.s32.totalorder %s31_s20, 0  ;;  %p41_p12 = scmp.ne.s32.totalorder %s1749_s11, %s1745_s10 }
  0x3a   : > { %p42_p9 = scmp.eq.s32.totalorder %s1753_s12, 0  ;;  %p1471_p13 = scmp.lt.s32.totalorder %s1753_s12, 2 }
  0x3b   : > { %s1913_s29 = scalar_select %p32_p1, %s1749_s11, %s34_s28  }
  0x3c   : > { %p43_p0 = por %p42_p9, %p41_p12  ;;  %p1917_p3 = por %p239_p2, %p41_p12 }
  0x3d   : > { %1459 = dma.hbm_to_vmem [thread:$0]  (!%p1863_p11), %s2194_s7, 1024, %s303_s24, [#allocation9], %s2180_s26, %s2180_s26, %s2181_s27  }
  0x3e   : > { %s2195_s14 = scalar_select %p1917_p3, 1, 0 }
  0x3f   : > { %s319_s18 = sand.u32 1, %s1749_s11   ;;  %s1277_s21 = sshll.u32 %s1753_s12, 9 }
  0x40   : > { %s1222_s24 = sshll.u32 %s319_s18, 5  ;;  %s1926_s25 = scalar_lea.hbm %s2169_s0, %s1277_s21 }
  0x41   : > { %s323_s20 = scalar_lea.vmem [#allocation2], %s1222_s24  ;;  %p1928_p11 = pnand %p1471_p13, %p43_p0 }
  0x42   : > { %s330_s28 = sshll.u32 %s323_s20, 4  ;;  %s1934_s27 = scalar_lea.sflag [#allocation3], %s319_s18  ;;  %s1932_s28 = int_to_ptr.vmem [resolvable:$true] %s330_s28 }
  0x43   : > { %s1653_s1 = scalar_lea.hbm %s1926_s25, 512  ;;  %p1655_p5 = pneg %p1928_p11 }
  0x44   : > { %p1654_p2 = scmp.ne.s32.totalorder %s1926_s25, %s1653_s1  ;;  %s1658_s24 = scalar_lea.hbm %s2169_s0, 1024 }
  0x45   : > { %p1659_p1 = scmp.lt.s32.totalorder %s1926_s25, %s2169_s0  ;;  %p1660_p12 = scmp.lt.s32.totalorder %s1658_s24, %s1653_s1 }
  0x46   : > { %p1656_p10 = pnand %p1655_p5, %p1654_p2 }
  0x47   : > { %p1661_p9 = por %p1660_p12, %p1659_p1 }
  0x48   : > { %p1657_p7 = pneg %p1656_p10 }
  0x4a   : > { %p1662_p13 = pnand %p1661_p9, %p1657_p7 }
  0x4c   : > { %1665 = shalt.err (!%p1662_p13)
}
  0x4d   : > { %s1666_s18 = scalar_lea.vmem %s1932_s28, 512  ;;  %s1760_s5 = smov [#allocation2]  }
  0x4e   : > { %p1667_p0 = scmp.ne.s32.totalorder %s1932_s28, %s1666_s18  ;;  %s1671_s7 = sshll.u32 %s1760_s5, 4  ;;  %s1672_s7 = int_to_ptr.vmem [resolvable:$false] %s1671_s7 }
  0x4f   : > { %s1673_s21 = scalar_lea.vmem %s1672_s7, 1024  ;;  %p1674_p10 = scmp.lt.s32.totalorder %s1932_s28, %s1672_s7 }
  0x50   : > { %p1669_p6 = pnand %p1667_p0, %p1655_p5  ;;  %p1675_p3 = scmp.lt.s32.totalorder %s1673_s21, %s1666_s18 }
  0x52   : > { %p1670_p2 = pneg %p1669_p6  ;;  %p1676_p4 = por %p1675_p3, %p1674_p10 }
  0x54   : > { %p1677_p8 = pnand %p1676_p4, %p1670_p2 }
  0x56   : > { %1680 = shalt.err (!%p1677_p8)
}
  0x57   : > { %s2197_s1 = smov 4   ;;  %s2198_s19 = smov 64  }
  0x58   : > { %1463 = dma.hbm_to_vmem [thread:$0]  (!%p1928_p11), %s1926_s25, 512, %s1932_s28, %s1934_s27, %s2198_s19, %s2198_s19, %s2197_s1  }
  0x59   : > { %p2199_p6 = scmp.ne.s32.totalorder %s2190_s17, 0 }
  0x5a   : > { %s1961_s5 = sand.u32 (!%p2199_p6), 1, %s1745_s10   ;;  %p2200_p4 = scmp.ne.s32.totalorder (!%p2199_p6), %s2188_s15, 0 }
  0x5b   : > { %342 = sbr.rel (%p2199_p6) target bundleno = 981 (0x3d5), region = 56  ;;  %s1226_s7 = sshll.u32 (!%p2199_p6), %s1961_s5, 5 }
  0x5c   : > { %s345_s24 = scalar_lea.sflag (!%p2199_p6), [#allocation3], %s1961_s5  ;;  %s1967_s26 = scalar_lea.vmem (!%p2199_p6), [#allocation2], %s1226_s7 }
  0x60   : > { %1724 = dma.done.wait (%p2200_p4), %s345_s24, 512  }
  0x61   : > { %1726 = vsyncadd (%p2200_p4), %s345_s24, 4294966784  ;;  %p2201_p8 = scmp.eq.s32.totalorder %s1835_s13, 0 }
  0x63   : > { %1728 = dma.done.wait (%p2201_p8), [#allocation6], 2048   ;;  %p2202_p3 = pmov %p2201_p8 }
  0x65   : > { %1730 = vsyncadd (%p2202_p3), [#allocation6], 4294965248  ;;  %p2203_p11 = pmov %p2202_p3 }
  0x66   : > { %p2204_p5 = pmov %p2202_p3 }
  0x67   : > { %1732 = dma.done.wait (%p2203_p11), [#allocation9], 1024  }
  0x68   : > { %1734 = vsyncadd (%p2204_p5), [#allocation9], 4294966272  ;;  %v1515_v0 = vld [vmem:[#allocation5 + $0x38] sm:$0xff]   ;;  %v1516_v1 = vld [vmem:[#allocation5 + $0x30] sm:$0xff]   ;;  %s394_s19 = scalar_lea.vmem [#allocation10], %s1226_s7  ;;  %s1101_s27 = scalar_lea.sflag [#allocation4], %s1961_s5 }
  0x69   : > { %1346 = vmatprep.subr.bf16.mxu0 %v1515_v0  ;;  %v1517_v2 = vld [vmem:[#allocation5 + $0x28] sm:$0xff]   ;;  %v1518_v3 = vld [vmem:[#allocation5 + $0x20] sm:$0xff]   ;;  %v1519_v5 = vld [vmem:[#allocation5 + $0x18] sm:$0xff]   ;;  %s1114_s24 = sshll.u32 %s394_s19, 4  ;;  %p2205_p1 = scmp.ne.s32.totalorder %s2195_s14, 0  ;;  %s2119_s24 = int_to_ptr.vmem [resolvable:$true] %s1114_s24 }
  0x6a   : > { %1347 = vmatpush3.bf16.msra.mxu0 %v1515_v0  ;;  %v1523_v4 = vld [vmem:[%s1967_s26] sm:$0xff]   ;;  %v1520_v6 = vld [vmem:[#allocation5 + $0x10] sm:$0xff]   ;;  %v1521_v7 = vld [vmem:[#allocation5 + $0x8] sm:$0xff]   ;;  %s1761_s25 = smov [#allocation10]  }
  0x6b   : > { %1348 = vmatprep.subr.bf16.mxu0 %v1516_v1  ;;  %1362 = vmatprep.mubr.bf16.mxu0 %v1523_v4  ;;  %v1522_v8 = vld [vmem:[#allocation5] sm:$0xff]   ;;  %v1524_v9 = vld [vmem:[%s1967_s26 + $0x8] sm:$0xff]   ;;  %v1525_v10 = vld [vmem:[%s1967_s26 + $0x10] sm:$0xff]   ;;  %s1685_s28 = sshll.u32 %s1761_s25, 4  ;;  %s1686_s28 = int_to_ptr.vmem [resolvable:$false] %s1685_s28 }
  0x6c   : > { %v1526_v11 = vld [vmem:[%s1967_s26 + $0x18] sm:$0xff]   ;;  %v1231_v12 = vld [vmem:[%s2171_s2] ss:$0 sm:$0xff]  ;;  %v1528_v36 = vld [vmem:[#allocation7 + $0x30] sm:$0xff]   ;;  %s1286_s26 = sshll.u32 %s1835_s13, 9  ;;  %s1681_s13 = scalar_lea.vmem %s2119_s24, 512 }
  0x6d   : > { %v1527_v33 = vld [vmem:[#allocation7 + $0x38] sm:$0xff]   ;;  %v1529_v39 = vld [vmem:[#allocation7 + $0x28] sm:$0xff]   ;;  %v1530_v40 = vld [vmem:[#allocation7 + $0x20] sm:$0xff]   ;;  %s2126_s17 = scalar_lea.hbm %s2178_s9, %s1286_s26  ;;  %p1682_p7 = scmp.ne.s32.totalorder %s2119_s24, %s1681_s13 }
  0x6e   : > { %1349 = vmatpush3.bf16.msra.mxu0 %v1516_v1  ;;  %1370 = vmatprep.subr.bf16.mxu1 %v1527_v33  ;;  %v1531_v41 = vld [vmem:[#allocation7 + $0x18] sm:$0xff]   ;;  %v1532_v42 = vld [vmem:[#allocation7 + $0x10] sm:$0xff]   ;;  %v1533_v43 = vld [vmem:[#allocation7 + $0x8] sm:$0xff]   ;;  %s1687_s23 = scalar_lea.vmem %s1686_s28, 1024  ;;  %p1688_p13 = scmp.lt.s32.totalorder %s2119_s24, %s1686_s28 }
  0x6f   : > { %1350 = vmatprep.subr.bf16.mxu0 %v1517_v2  ;;  %1371 = vmatpush3.bf16.msra.mxu1 %v1527_v33  ;;  %v1534_v44 = vld [vmem:[#allocation7] sm:$0xff]   ;;  %p1683_p12 = pnand %p1682_p7, %p2205_p1  ;;  %p1689_p0 = scmp.lt.s32.totalorder %s1687_s23, %s1681_s13 }
  0x70   : > { %1372 = vmatprep.subr.bf16.mxu1 %v1528_v36 }
  0x71   : > { %p1684_p9 = pneg %p1683_p12  ;;  %p1690_p2 = por %p1689_p0, %p1688_p13 }
  0x72   : > { %1351 = vmatpush3.bf16.msra.mxu0 %v1517_v2 }
  0x73   : > { %1352 = vmatprep.subr.bf16.mxu0 %v1518_v3  ;;  %1373 = vmatpush3.bf16.msra.mxu1 %v1528_v36  ;;  %p1691_p10 = pnand %p1690_p2, %p1684_p9 }
  0x74   : > { %1374 = vmatprep.subr.bf16.mxu1 %v1529_v39 }
  0x76   : > { %1353 = vmatpush3.bf16.msra.mxu0 %v1518_v3 }
  0x77   : > { %1354 = vmatprep.subr.bf16.mxu0 %v1519_v5  ;;  %1375 = vmatpush3.bf16.msra.mxu1 %v1529_v39 }
  0x78   : > { %1376 = vmatprep.subr.bf16.mxu1 %v1530_v40 }
  0x7a   : > { %1355 = vmatpush3.bf16.msra.mxu0 %v1519_v5 }
  0x7b   : > { %1356 = vmatprep.subr.bf16.mxu0 %v1520_v6  ;;  %1377 = vmatpush3.bf16.msra.mxu1 %v1530_v40 }
  0x7c   : > { %1378 = vmatprep.subr.bf16.mxu1 %v1531_v41 }
  0x7e   : > { %1357 = vmatpush3.bf16.msra.mxu0 %v1520_v6 }
  0x7f   : > { %1358 = vmatprep.subr.bf16.mxu0 %v1521_v7  ;;  %1379 = vmatpush3.bf16.msra.mxu1 %v1531_v41 }
  0x80   : > { %1380 = vmatprep.subr.bf16.mxu1 %v1532_v42 }
  0x82   : > { %1359 = vmatpush3.bf16.msra.mxu0 %v1521_v7 }
  0x83   : > { %1360 = vmatprep.subr.bf16.mxu0 %v1522_v8  ;;  %1381 = vmatpush3.bf16.msra.mxu1 %v1532_v42 }
  0x84   : > { %1382 = vmatprep.subr.bf16.mxu1 %v1533_v43 }
  0x86   : > { %1361 = vmatpush3.bf16.msra.mxu0 %v1522_v8 }
  0x87   : > { %1383 = vmatpush3.bf16.msra.mxu1 %v1533_v43 }
  0x88   : > { %1384 = vmatprep.subr.bf16.mxu1 %v1534_v44 }
  0x89   : > { %1363 = vmatmul.mubr.bf16.vlgmr.msra.gmra.mxu0 %v1524_v9 }
  0x8a   : > { %1366 = vmatprep.mubr.bf16.mxu0 %v1525_v10 }
  0x8b   : > { %1385 = vmatpush3.bf16.msra.mxu1 %v1534_v44 }
  0x91   : > { %1367 = vmatmul.mubr.bf16.gmra.mxu0 %v1526_v11 }
 0x149   : > { %v1364_v13 = vpop.f32.mrf.mxu0 }
 0x14a   : > { %v1988_v14 = vadd.f32 %v1364_v13, %v1231_v12 }
 0x14b   : > { %v535_v15 = vpop.f32.mrf.mxu0 }
 0x14c   : > { %v1990_v16 = vadd.f32 %v1231_v12, %v535_v15  ;;  %570 = vadd.xlane.f32.xlu1 %v1988_v14  ;;  %v592_v20 = vmul.f32 %v1988_v14, %v1988_v14 }
 0x14d   : > { %v1365_v17 = vpop.f32.mrf.mxu0 }
 0x14e   : > { %v1993_v18 = vadd.f32 %v1365_v17, %v1231_v12  ;;  %566 = vadd.xlane.f32.xlu0 %v1990_v16  ;;  %v590_v25 = vmul.f32 %v1990_v16, %v1990_v16 }
 0x14f   : > { %v538_v19 = vpop.f32.mrf.mxu0 }
 0x150   : > { %572 = vadd.xlane.f32.xlu1 %v1993_v18  ;;  %v1999_v22 = vadd.f32 %v1231_v12, %v538_v19  ;;  %v593_v23 = vmul.f32 %v1993_v18, %v1993_v18 }
 0x151   : > { %v1368_v21 = vpop.f32.mrf.mxu0 }
 0x152   : > { %602 = vadd.xlane.f32.xlu0 %v592_v20  ;;  %v591_v26 = vmul.f32 %v1999_v22, %v1999_v22  ;;  %v2010_v30 = vadd.f32 %v1368_v21, %v1231_v12 }
 0x153   : > { %v551_v24 = vpop.f32.mrf.mxu0 }
 0x154   : > { %604 = vadd.xlane.f32.xlu1 %v593_v23  ;;  %v2016_v32 = vadd.f32 %v1231_v12, %v551_v24  ;;  %v596_v38 = vmul.f32 %v2010_v30, %v2010_v30 }
 0x155   : > { %v1369_v27 = vpop.f32.mrf.mxu0 }
 0x156   : > { %598 = vadd.xlane.f32.xlu0 %v590_v25  ;;  %v2007_v28 = vadd.f32 %v1369_v27, %v1231_v12  ;;  %v594_v35 = vmul.f32 %v2016_v32, %v2016_v32 }
 0x157   : > { %v554_v29 = vpop.f32.mrf.mxu0 }
 0x158   : > { %600 = vadd.xlane.f32.xlu1 %v591_v26  ;;  %v2013_v31 = vadd.f32 %v1231_v12, %v554_v29  ;;  %v597_v37 = vmul.f32 %v2007_v28, %v2007_v28 }
 0x15a   : > { %568 = vadd.xlane.f32.xlu0 %v1999_v22  ;;  %v595_v34 = vmul.f32 %v2013_v31, %v2013_v31 }
 0x15c   : > { %580 = vadd.xlane.f32.xlu1 %v2007_v28 }
 0x15e   : > { %578 = vadd.xlane.f32.xlu0 %v2010_v30 }
 0x160   : > { %576 = vadd.xlane.f32.xlu1 %v2013_v31 }
 0x162   : > { %574 = vadd.xlane.f32.xlu0 %v2016_v32 }
 0x164   : > { %608 = vadd.xlane.f32.xlu1 %v595_v34 }
 0x166   : > { %606 = vadd.xlane.f32.xlu0 %v594_v35 }
 0x168   : > { %612 = vadd.xlane.f32.xlu1 %v597_v37 }
 0x16a   : > { %610 = vadd.xlane.f32.xlu0 %v596_v38 }
 0x1d5   : > { %v571_v45 = vpop.xlane.xlu1 %570 }
 0x1d6   : > { %v2028_v47 = vmul.f32 0.125, %v571_v45 }
 0x1d7   : > { %v567_v46 = vpop.xlane.xlu0 %566 }
 0x1d8   : > { %v2030_v51 = vmul.f32 0.125, %v567_v46  ;;  %v624_v53 = vmul.f32 %v2028_v47, %v2028_v47 }
 0x1d9   : > { %v573_v48 = vpop.xlane.xlu1 %572 }
 0x1da   : > { %v585_v49 = vmul.f32 0.125, %v573_v48  ;;  %v622_v59 = vmul.f32 %v2030_v51, %v2030_v51  ;;  %v638_v39 = vsub.f32 %v1990_v16, %v2030_v51  ;;  %v640_v48 = vsub.f32 %v1988_v14, %v2028_v47 }
 0x1db   : > { %v603_v50 = vpop.xlane.xlu0 %602 }
 0x1dc   : > { %v616_v52 = vmul.f32 0.125, %v603_v50  ;;  %v625_v55 = vmul.f32 %v585_v49, %v585_v49  ;;  %v641_v40 = vsub.f32 %v1993_v18, %v585_v49 }
 0x1dd   : > { %v605_v54 = vpop.xlane.xlu1 %604 }
 0x1de   : > { %v617_v56 = vmul.f32 0.125, %v605_v54  ;;  %v632_v57 = vsub.f32 %v616_v52, %v624_v53 }
 0x1df   : > { %v599_v58 = vpop.xlane.xlu0 %598 }
 0x1e0   : > { %v633_v60 = vsub.f32 %v617_v56, %v625_v55  ;;  %v614_v61 = vmul.f32 0.125, %v599_v58  ;;  %v648_v1 = vadd.f32 1e-06, %v632_v57  ;;  %v1244_v56 = vld [vmem:[%s2172_s3] ss:$0 sm:$0xff] }
 0x1e1   : > { %v601_v62 = vpop.xlane.xlu1 %600 }
 0x1e2   : > { %v649_v63 = vadd.f32 1e-06, %v633_v60  ;;  %v630_v0 = vsub.f32 %v614_v61, %v622_v59  ;;  %v615_v6 = vmul.f32 0.125, %v601_v62  ;;  %v1245_v62 = vld [vmem:[%s2173_s4] ss:$0 sm:$0xff] }
 0x1e3   : > { %v569_v2 = vpop.xlane.xlu0 %568 }
 0x1e4   : > { %v646_v3 = vadd.f32 1e-06, %v630_v0  ;;  %v583_v4 = vmul.f32 0.125, %v569_v2  ;;  %1543 = vrsqrt.f32 %v649_v63 }
 0x1e5   : > { %v581_v5 = vpop.xlane.xlu1 %580 }
 0x1e6   : > { %1545 = vrsqrt.f32 %v646_v3  ;;  %v623_v7 = vmul.f32 %v583_v4, %v583_v4  ;;  %v2036_v19 = vmul.f32 0.125, %v581_v5  ;;  %v639_v49 = vsub.f32 %v1999_v22, %v583_v4 }
 0x1e7   : > { %1547 = vrsqrt.f32 %v648_v1  ;;  %v579_v8 = vpop.xlane.xlu0 %578 }
 0x1e8   : > { %v631_v9 = vsub.f32 %v615_v6, %v623_v7  ;;  %v2038_v23 = vmul.f32 0.125, %v579_v8  ;;  %v629_v34 = vmul.f32 %v2036_v19, %v2036_v19 }
 0x1e9   : > { %v577_v10 = vpop.xlane.xlu1 %576 }
 0x1ea   : > { %v647_v11 = vadd.f32 1e-06, %v631_v9  ;;  %v587_v12 = vmul.f32 0.125, %v577_v10  ;;  %v628_v41 = vmul.f32 %v2038_v23, %v2038_v23  ;;  %v645_v10 = vsub.f32 %v2007_v28, %v2036_v19  ;;  %v1535_v19 = vld [vmem:[#allocation8 + $0x38] sm:$0xff]  }
 0x1eb   : > { %v575_v13 = vpop.xlane.xlu0 %574  ;;  %1394 = vmatprep.subr.bf16.mxu0 %v1535_v19  ;;  %1418 = vmatprep.subr.bf16.mxu1 %v1535_v19 }
 0x1ec   : > { %1549 = vrsqrt.f32 %v647_v11  ;;  %v586_v15 = vmul.f32 0.125, %v575_v13  ;;  %v627_v20 = vmul.f32 %v587_v12, %v587_v12  ;;  %v643_v3 = vsub.f32 %v2013_v31, %v587_v12  ;;  %1395 = vmatpush3.bf16.msra.mxu0 %v1535_v19 }
 0x1ed   : > { %v609_v17 = vpop.xlane.xlu1 %608 }
 0x1ee   : > { %v619_v21 = vmul.f32 0.125, %v609_v17  ;;  %v626_v25 = vmul.f32 %v586_v15, %v586_v15  ;;  %v642_v7 = vsub.f32 %v2016_v32, %v586_v15 }
 0x1ef   : > { %v607_v24 = vpop.xlane.xlu0 %606 }
 0x1f0   : > { %v635_v26 = vsub.f32 %v619_v21, %v627_v20  ;;  %v618_v27 = vmul.f32 0.125, %v607_v24  ;;  %v644_v20 = vsub.f32 %v2010_v30, %v2038_v23  ;;  %v1536_v23 = vld [vmem:[#allocation8 + $0x30] sm:$0xff]  }
 0x1f1   : > { %v613_v29 = vpop.xlane.xlu1 %612  ;;  %v1544_v33 = vpop.eup %1543  ;;  %1396 = vmatprep.subr.bf16.mxu0 %v1536_v23 }
 0x1f2   : > { %v651_v35 = vadd.f32 1e-06, %v635_v26  ;;  %v634_v36 = vsub.f32 %v618_v27, %v626_v25  ;;  %v621_v37 = vmul.f32 0.125, %v613_v29  ;;  %v665_v50 = vmul.f32 %v1544_v33, %v641_v40  ;;  %1397 = vmatpush3.bf16.msra.mxu0 %v1536_v23  ;;  %v1540_v40 = vld [vmem:[#allocation8 + $0x10] sm:$0xff]  }
 0x1f3   : > { %v1546_v38 = vpop.eup %1545  ;;  %v611_v42 = vpop.xlane.xlu0 %610 }
 0x1f4   : > { %v1548_v43 = vpop.eup %1547  ;;  %1551 = vrsqrt.f32 %v651_v35  ;;  %v650_v44 = vadd.f32 1e-06, %v634_v36  ;;  %v637_v45 = vsub.f32 %v621_v37, %v629_v34  ;;  %v620_v46 = vmul.f32 0.125, %v611_v42  ;;  %v1537_v37 = vld [vmem:[#allocation8 + $0x28] sm:$0xff]   ;;  %v1542_v42 = vld [vmem:[#allocation8] sm:$0xff]  }
 0x1f5   : > { %v662_v54 = vmul.f32 %v1546_v38, %v638_v39  ;;  %v664_v51 = vmul.f32 %v1548_v43, %v640_v48  ;;  %v680_v58 = vmul.f32 %v1244_v56, %v665_v50  ;;  %1398 = vmatprep.subr.bf16.mxu0 %v1537_v37  ;;  %v1538_v38 = vld [vmem:[#allocation8 + $0x20] sm:$0xff]   ;;  %v1539_v39 = vld [vmem:[#allocation8 + $0x18] sm:$0xff]  }
 0x1f6   : > { %1553 = vrsqrt.f32 %v650_v44  ;;  %v653_v52 = vadd.f32 1e-06, %v637_v45  ;;  %v636_v53 = vsub.f32 %v620_v46, %v628_v41  ;;  %1399 = vmatpush3.bf16.msra.mxu0 %v1537_v37  ;;  %v1541_v41 = vld [vmem:[#allocation8 + $0x8] sm:$0xff]   ;;  %v1246_v43 = vld [vmem:[%s2175_s6] ss:$0 sm:$0xff] }
 0x1f7   : > { %v677_v60 = vmul.f32 %v1244_v56, %v662_v54  ;;  %v679_v47 = vmul.f32 %v1244_v56, %v664_v51  ;;  %v695_v63 = vadd.f32 %v1245_v62, %v680_v58  ;;  %1400 = vmatprep.subr.bf16.mxu0 %v1538_v38 }
 0x1f8   : > { %1555 = vrsqrt.f32 %v653_v52  ;;  %v652_v55 = vadd.f32 1e-06, %v636_v53 }
 0x1f9   : > { %v1550_v57 = vpop.eup %1549  ;;  %v692_v0 = vadd.f32 %v1245_v62, %v677_v60  ;;  %v694_v2 = vadd.f32 %v1245_v62, %v679_v47 }
 0x1fa   : > { %v663_v59 = vmul.f32 %v1550_v57, %v639_v49  ;;  %1557 = vrsqrt.f32 %v652_v55  ;;  %1401 = vmatpush3.bf16.msra.mxu0 %v1538_v38 }
 0x1fb   : > { %v701_v6 = vpack.c.bf16 %v695_v63, %v694_v2  ;;  %1402 = vmatprep.subr.bf16.mxu0 %v1539_v39 }
 0x1fc   : > { %v678_v61 = vmul.f32 %v1244_v56, %v663_v59 }
 0x1fe   : > { %v693_v1 = vadd.f32 %v1245_v62, %v678_v61  ;;  %1403 = vmatpush3.bf16.msra.mxu0 %v1539_v39 }
 0x1ff   : > { %1404 = vmatprep.subr.bf16.mxu0 %v1540_v40 }
 0x200   : > { %v700_v4 = vpack.c.bf16 %v693_v1, %v692_v0 }
 0x201   : > { %v1552_v5 = vpop.eup %1551 }
 0x202   : > { %1386 = vmatprep.mubr.bf16.mxu1 %v700_v4  ;;  %v667_v8 = vmul.f32 %v1552_v5, %v643_v3  ;;  %1405 = vmatpush3.bf16.msra.mxu0 %v1540_v40 }
 0x203   : > { %v1554_v9 = vpop.eup %1553  ;;  %1387 = vmatmul.mubr.bf16.vlgmr.msra.gmra.mxu1 %v701_v6  ;;  %1406 = vmatprep.subr.bf16.mxu0 %v1541_v41 }
 0x204   : > { %v666_v11 = vmul.f32 %v1554_v9, %v642_v7  ;;  %v682_v13 = vmul.f32 %v1244_v56, %v667_v8  ;;  %1426 = vmatpush3.bf16.msra.mxu1 %v1535_v19 }
 0x205   : > { %v1556_v17 = vpop.eup %1555  ;;  %1419 = vmatprep.subr.bf16.mxu1 %v1536_v23 }
 0x206   : > { %v681_v21 = vmul.f32 %v1244_v56, %v666_v11  ;;  %v669_v12 = vmul.f32 %v1556_v17, %v645_v10  ;;  %v697_v26 = vadd.f32 %v1245_v62, %v682_v13  ;;  %1407 = vmatpush3.bf16.msra.mxu0 %v1541_v41 }
 0x207   : > { %v1558_v24 = vpop.eup %1557  ;;  %1408 = vmatprep.subr.bf16.mxu0 %v1542_v42 }
 0x208   : > { %v696_v25 = vadd.f32 %v1245_v62, %v681_v21  ;;  %v668_v27 = vmul.f32 %v1558_v24, %v644_v20  ;;  %v684_v15 = vmul.f32 %v1244_v56, %v669_v12  ;;  %1427 = vmatpush3.bf16.msra.mxu1 %v1536_v23 }
 0x209   : > { %1420 = vmatprep.subr.bf16.mxu1 %v1537_v37 }
 0x20a   : > { %v702_v29 = vpack.c.bf16 %v697_v26, %v696_v25  ;;  %v683_v33 = vmul.f32 %v1244_v56, %v668_v27  ;;  %v699_v35 = vadd.f32 %v1245_v62, %v684_v15  ;;  %1409 = vmatpush3.bf16.msra.mxu0 %v1542_v42 }
 0x20c   : > { %1390 = vmatprep.mubr.bf16.mxu1 %v702_v29  ;;  %v698_v34 = vadd.f32 %v1245_v62, %v683_v33  ;;  %1428 = vmatpush3.bf16.msra.mxu1 %v1537_v37 }
 0x20d   : > { %1421 = vmatprep.subr.bf16.mxu1 %v1538_v38 }
 0x20e   : > { %v703_v36 = vpack.c.bf16 %v699_v35, %v698_v34 }
 0x210   : > { %1391 = vmatmul.mubr.bf16.gmra.mxu1 %v703_v36 }
 0x211   : > { %1429 = vmatpush3.bf16.msra.mxu1 %v1538_v38 }
 0x212   : > { %1422 = vmatprep.subr.bf16.mxu1 %v1539_v39 }
 0x215   : > { %1430 = vmatpush3.bf16.msra.mxu1 %v1539_v39 }
 0x216   : > { %1423 = vmatprep.subr.bf16.mxu1 %v1540_v40 }
 0x219   : > { %1431 = vmatpush3.bf16.msra.mxu1 %v1540_v40 }
 0x21a   : > { %1424 = vmatprep.subr.bf16.mxu1 %v1541_v41 }
 0x21d   : > { %1432 = vmatpush3.bf16.msra.mxu1 %v1541_v41 }
 0x21e   : > { %1425 = vmatprep.subr.bf16.mxu1 %v1542_v42 }
 0x221   : > { %1433 = vmatpush3.bf16.msra.mxu1 %v1542_v42 }
 0x2c3   : > { %v1388_v44 = vpop.f32.mrf.mxu1 }
 0x2c4   : > { %v2065_v45 = vadd.f32 %v1388_v44, %v1246_v43 }
 0x2c5   : > { %v809_v46 = vpop.f32.mrf.mxu1 }
 0x2c6   : > { %v842_v48 = vmul.f32 %v2065_v45, %v2065_v45  ;;  %v2069_v50 = vadd.f32 %v1246_v43, %v809_v46 }
 0x2c7   : > { %v1389_v52 = vpop.f32.mrf.mxu1 }
 0x2c8   : > { %v850_v53 = vmul.f32 %v842_v48, %v2065_v45  ;;  %v840_v54 = vmul.f32 %v2069_v50, %v2069_v50  ;;  %v2074_v51 = vadd.f32 %v1389_v52, %v1246_v43 }
 0x2c9   : > { %v812_v49 = vpop.f32.mrf.mxu1 }
 0x2ca   : > { %v858_v55 = vmul.f32 0.044715, %v850_v53  ;;  %v848_v56 = vmul.f32 %v840_v54, %v2069_v50  ;;  %v843_v57 = vmul.f32 %v2074_v51, %v2074_v51  ;;  %v2079_v58 = vadd.f32 %v1246_v43, %v812_v49 }
 0x2cc   : > { %v866_v59 = vadd.f32 %v858_v55, %v2065_v45  ;;  %v856_v60 = vmul.f32 0.044715, %v848_v56  ;;  %v851_v47 = vmul.f32 %v843_v57, %v2074_v51  ;;  %v841_v61 = vmul.f32 %v2079_v58, %v2079_v58 }
 0x2ce   : > { %v874_v62 = vmul.f32 0.7978846, %v866_v59  ;;  %v864_v63 = vadd.f32 %v856_v60, %v2069_v50  ;;  %v859_v0 = vmul.f32 0.044715, %v851_v47  ;;  %v849_v1 = vmul.f32 %v841_v61, %v2079_v58 }
 0x2d0   : > { %v872_v2 = vmul.f32 0.7978846, %v864_v63  ;;  %v867_v3 = vadd.f32 %v859_v0, %v2074_v51  ;;  %v857_v4 = vmul.f32 0.044715, %v849_v1  ;;  %v1392_v5 = vpop.f32.mrf.mxu1  ;;  %1559 = vtanh.f32 %v874_v62 }
 0x2d1   : > { %v2088_v6 = vadd.f32 %v1392_v5, %v1246_v43 }
 0x2d2   : > { %1561 = vtanh.f32 %v872_v2  ;;  %v875_v7 = vmul.f32 0.7978846, %v867_v3  ;;  %v865_v8 = vadd.f32 %v857_v4, %v2079_v58  ;;  %v825_v9 = vpop.f32.mrf.mxu1 }
 0x2d3   : > { %v846_v10 = vmul.f32 %v2088_v6, %v2088_v6  ;;  %v2093_v11 = vadd.f32 %v1246_v43, %v825_v9 }
 0x2d4   : > { %1563 = vtanh.f32 %v875_v7  ;;  %v873_v13 = vmul.f32 0.7978846, %v865_v8  ;;  %v1393_v17 = vpop.f32.mrf.mxu1 }
 0x2d5   : > { %v854_v20 = vmul.f32 %v846_v10, %v2088_v6  ;;  %v844_v21 = vmul.f32 %v2093_v11, %v2093_v11  ;;  %v837_v12 = vadd.f32 %v1393_v17, %v1246_v43 }
 0x2d6   : > { %1565 = vtanh.f32 %v873_v13  ;;  %v828_v24 = vpop.f32.mrf.mxu1 }
 0x2d7   : > { %v862_v25 = vmul.f32 0.044715, %v854_v20  ;;  %v852_v26 = vmul.f32 %v844_v21, %v2093_v11  ;;  %v847_v27 = vmul.f32 %v837_v12, %v837_v12  ;;  %v829_v15 = vadd.f32 %v1246_v43, %v828_v24 }
 0x2d9   : > { %v870_v29 = vadd.f32 %v862_v25, %v2088_v6  ;;  %v860_v33 = vmul.f32 0.044715, %v852_v26  ;;  %v855_v34 = vmul.f32 %v847_v27, %v837_v12  ;;  %v845_v35 = vmul.f32 %v829_v15, %v829_v15  ;;  %v1255_v27 = vld [vmem:[%s2177_s8] ss:$0 sm:$0xff] }
 0x2db   : > { %v878_v36 = vmul.f32 0.7978846, %v870_v29  ;;  %v868_v19 = vadd.f32 %v860_v33, %v2093_v11  ;;  %v863_v23 = vmul.f32 0.044715, %v855_v34  ;;  %v853_v37 = vmul.f32 %v845_v35, %v829_v15 }
 0x2dd   : > { %v876_v38 = vmul.f32 0.7978846, %v868_v19  ;;  %v871_v39 = vadd.f32 %v863_v23, %v837_v12  ;;  %v861_v40 = vmul.f32 0.044715, %v853_v37  ;;  %v1560_v41 = vpop.eup %1559  ;;  %1567 = vtanh.f32 %v878_v36 }
 0x2de   : > { %v890_v52 = vadd.f32 1.0, %v1560_v41 }
 0x2df   : > { %v1562_v42 = vpop.eup %1561  ;;  %1569 = vtanh.f32 %v876_v38  ;;  %v879_v44 = vmul.f32 0.7978846, %v871_v39  ;;  %v869_v46 = vadd.f32 %v861_v40, %v829_v15 }
 0x2e0   : > { %v888_v43 = vadd.f32 1.0, %v1562_v42  ;;  %v898_v59 = vmul.f32 0.5, %v890_v52 }
 0x2e1   : > { %v1564_v48 = vpop.eup %1563  ;;  %1571 = vtanh.f32 %v879_v44  ;;  %v877_v53 = vmul.f32 0.7978846, %v869_v46 }
 0x2e2   : > { %v891_v54 = vadd.f32 1.0, %v1564_v48  ;;  %v896_v57 = vmul.f32 0.5, %v888_v43  ;;  %v906_v63 = vmul.f32 %v898_v59, %v2065_v45 }
 0x2e3   : > { %v1566_v49 = vpop.eup %1565  ;;  %1573 = vtanh.f32 %v877_v53 }
 0x2e4   : > { %v899_v55 = vmul.f32 0.5, %v891_v54  ;;  %v889_v56 = vadd.f32 1.0, %v1566_v49  ;;  %v904_v61 = vmul.f32 %v896_v57, %v2069_v50 }
 0x2e6   : > { %v897_v60 = vmul.f32 0.5, %v889_v56  ;;  %v907_v47 = vmul.f32 %v899_v55, %v2074_v51 }
 0x2e8   : > { %v905_v62 = vmul.f32 %v897_v60, %v2079_v58  ;;  %v913_v2 = vpack.c.bf16 %v907_v47, %v906_v63 }
 0x2ea   : > { %v912_v0 = vpack.c.bf16 %v905_v62, %v904_v61  ;;  %v1568_v1 = vpop.eup %1567 }
 0x2eb   : > { %v894_v7 = vadd.f32 1.0, %v1568_v1 }
 0x2ec   : > { %v1570_v3 = vpop.eup %1569  ;;  %1410 = vmatprep.mubr.bf16.mxu0 %v912_v0 }
 0x2ed   : > { %1411 = vmatmul.mubr.bf16.vlgmr.msra.gmra.mxu0 %v913_v2  ;;  %v892_v4 = vadd.f32 1.0, %v1570_v3  ;;  %v902_v17 = vmul.f32 0.5, %v894_v7 }
 0x2ee   : > { %v1572_v5 = vpop.eup %1571 }
 0x2ef   : > { %v895_v8 = vadd.f32 1.0, %v1572_v5  ;;  %v900_v51 = vmul.f32 0.5, %v892_v4  ;;  %v910_v21 = vmul.f32 %v902_v17, %v2088_v6 }
 0x2f0   : > { %v1574_v9 = vpop.eup %1573 }
 0x2f1   : > { %v903_v10 = vmul.f32 0.5, %v895_v8  ;;  %v893_v13 = vadd.f32 1.0, %v1574_v9  ;;  %v908_v58 = vmul.f32 %v900_v51, %v2093_v11 }
 0x2f3   : > { %v901_v50 = vmul.f32 0.5, %v893_v13  ;;  %v911_v20 = vmul.f32 %v903_v10, %v837_v12 }
 0x2f5   : > { %v909_v45 = vmul.f32 %v901_v50, %v829_v15  ;;  %v915_v25 = vpack.c.bf16 %v911_v20, %v910_v21 }
 0x2f7   : > { %v914_v24 = vpack.c.bf16 %v909_v45, %v908_v58 }
 0x2f9   : > { %1414 = vmatprep.mubr.bf16.mxu1 %v914_v24 }
 0x2fa   : > { %1415 = vmatmul.mubr.bf16.vlgmr.msra.gmra.mxu1 %v915_v25 }
 0x3ad   : > { %v1412_v26 = vpop.f32.mrf.mxu0 }
 0x3ae   : > { %v1030_v33 = vadd.f32 %v1412_v26, %v1255_v27 }
 0x3af   : > { %v1021_v29 = vpop.f32.mrf.mxu0 }
 0x3b0   : > { %v1022_v35 = vadd.f32 %v1255_v27, %v1021_v29  ;;  %v1054_v11 = vadd.f32 %v1030_v33, %v1988_v14 }
 0x3b1   : > { %v1413_v34 = vpop.f32.mrf.mxu0 }
 0x3b2   : > { %v1033_v12 = vadd.f32 %v1413_v34, %v1255_v27  ;;  %v1052_v19 = vadd.f32 %v1022_v35, %v1990_v16 }
 0x3b3   : > { %v1024_v36 = vpop.f32.mrf.mxu0 }
 0x3b4   : > { %v1055_v6 = vadd.f32 %v1033_v12, %v1993_v18  ;;  %v1025_v15 = vadd.f32 %v1255_v27, %v1024_v36 }
 0x3b6   : > { %v1295_v23 = vpack.c.bf16 %v1055_v6, %v1054_v11  ;;  %v1053_v37 = vadd.f32 %v1025_v15, %v1999_v22 }
 0x3b8   : > { %1307 = vst [vmem:[%s394_s19 + $0x8] sm:$0xff] %v1295_v23   ;;  %v1290_v38 = vpack.c.bf16 %v1053_v37, %v1052_v19 }
 0x3ba   : > { %1291 = vst [vmem:[%s394_s19] sm:$0xff] %v1290_v38   ;;  %v1416_v39 = vpop.f32.mrf.mxu1 }
 0x3bb   : > { %v1046_v41 = vadd.f32 %v1416_v39, %v1255_v27 }
 0x3bc   : > { %v1037_v40 = vpop.f32.mrf.mxu1 }
 0x3bd   : > { %v1038_v44 = vadd.f32 %v1255_v27, %v1037_v40  ;;  %v1058_v16 = vadd.f32 %v1046_v41, %v2010_v30 }
 0x3be   : > { %v1417_v42 = vpop.f32.mrf.mxu1 }
 0x3bf   : > { %v1049_v14 = vadd.f32 %v1417_v42, %v1255_v27  ;;  %v1056_v43 = vadd.f32 %v1038_v44, %v2016_v32 }
 0x3c0   : > { %v1040_v18 = vpop.f32.mrf.mxu1 }
 0x3c1   : > { %v1059_v22 = vadd.f32 %v1049_v14, %v2007_v28  ;;  %v1041_v46 = vadd.f32 %v1255_v27, %v1040_v18 }
 0x3c3   : > { %v1305_v48 = vpack.c.bf16 %v1059_v22, %v1058_v16  ;;  %v1057_v52 = vadd.f32 %v1041_v46, %v2013_v31 }
 0x3c5   : > { %1309 = vst [vmem:[%s394_s19 + $0x18] sm:$0xff] %v1305_v48   ;;  %v1300_v30 = vpack.c.bf16 %v1057_v52, %v1056_v43 }
 0x3c7   : > { %1308 = vst [vmem:[%s394_s19 + $0x10] sm:$0xff] %v1300_v30  }
 0x3c8   : > { %1694 = shalt.err (!%p1691_p10)
}
 0x3c9   : > { %s1695_s20 = scalar_lea.hbm %s2126_s17, 512  ;;  %s1699_s1 = scalar_lea.hbm %s2178_s9, 1024 }
 0x3ca   : > { %p1696_p6 = scmp.ne.s32.totalorder %s2126_s17, %s1695_s20  ;;  %p1700_p3 = scmp.lt.s32.totalorder %s2126_s17, %s2178_s9 }
 0x3cb   : > { %p1701_p11 = scmp.lt.s32.totalorder %s1699_s1, %s1695_s20 }
 0x3cc   : > { %p1697_p4 = pnand %p1696_p6, %p2205_p1 }
 0x3cd   : > { %p1702_p5 = por %p1701_p11, %p1700_p3 }
 0x3ce   : > { %p1698_p8 = pneg %p1697_p4 }
 0x3d0   : > { %p1703_p7 = pnand %p1702_p5, %p1698_p8 }
 0x3d2   : > { %1706 = shalt.err (!%p1703_p7)
}
 0x3d3   : > { %s1762_s7 = smov 64   ;;  %s1763_s15 = smov 4  }
 0x3d4   : > { %1448 = dma.vmem_to_hbm [thread:$0]  (%p2205_p1), %s2119_s24, 512, %s2126_s17, %s1101_s27, %s1762_s7, %s1762_s7, %s1763_s15  }
 0x3d5 PF: > { %s1129_s13 = sand.u32 1, %s1741_s30   ;;  %p2206_p12 = scmp.ne.s32.totalorder %s2189_s16, 0 }
 0x3d6   : > { %p2207_p9 = scmp.ge.s32.totalorder %s1753_s12, 2  ;;  %s1130_s25 = scalar_lea.sflag [#allocation4], %s1129_s13 }
 0x3d8   : > { %p1465_p13 = pnand %p2207_p9, %p2206_p12 }
 0x3da   : > { %p1466_p0 = pneg %p1465_p13 }
 0x3dc   : > { %1736 = dma.done.wait (%p1466_p0), %s1130_s25, 512  }
 0x3dd   : > { %1738 = vsyncadd (%p1466_p0), %s1130_s25, 4294966784  ;;  %p24_p2 = scmp.ge.s32.totalorder %s1903_s22, 4   ;;  %s2208_s30 = smov %s1745_s10 }
 0x3de   : > { %s2209_s10 = smov %s1749_s11  ;;  %s2210_s11 = smov %s1913_s29 }
 0x3df   : > { %s2211_s12 = smov %s1903_s22  ;;  %26 = sbr.rel (!%p24_p2) target bundleno = 11 (0xb), region = 113 }
 0x3e4   :  { %1135 = vsyncpa [#allocation3], 1 }
 0x3e5   :  { %1137 = vsyncpa [#allocation3 + $0x1], 1 }
 0x3e6   :  { %1138 = vsyncpa [#allocation6], 1 }
 0x3e7   :  { %1139 = vsyncpa [#allocation9], 1 }
 0x3e8   :  { %1140 = vsyncpa [#allocation4], 1 }
 0x3e9   :  { %1142 = vsyncpa [#allocation4 + $0x1], 1 }

</bundles_post_ra>
